<compile_context>
chip_gen: v5e
topology: v5e:2x2
jax: 0.10.0
libtpu: 0.0.40
codegen_flags: <defaults>
</compile_context>

<pallas_src>
import functools

import jax
import jax.numpy as jnp
from jax.experimental import pallas as pl
from jax.experimental.pallas import tpu as pltpu

EPS = 1e-5        # nn.BatchNorm2d default eps
LANE = 128        # TPU lane width
DEF_TP = 256      # row-tile size (multiple of 8; small enough for v7x's 64 MiB VMEM)


def _round_up(x, m):
    return (x + m - 1) // m * m


# ----------------------------- Pallas kernels ------------------------------ #
def _conv_stats_kernel(p_ref, w_ref, y_ref, sum_ref, sq_ref):
    """Pass A: bf16 im2col matmul (MXU, f32 accum) + per-channel sum / sum-of-squares."""
    @pl.when(pl.program_id(0) == 0)
    def _():
        sum_ref[...] = jnp.zeros_like(sum_ref)
        sq_ref[...] = jnp.zeros_like(sq_ref)

    y = jnp.dot(p_ref[...], w_ref[...], preferred_element_type=jnp.float32)
    y_ref[...] = y
    sum_ref[...] += jnp.sum(y, axis=0, keepdims=True)
    sq_ref[...] += jnp.sum(y * y, axis=0, keepdims=True)


def _bn_relu_kernel(inv_n, y_ref, sum_ref, sq_ref, g_ref, b_ref, o_ref):
    """Pass B: BN folded to per-channel scale/shift + ReLU."""
    mu = sum_ref[...] * inv_n
    var = jnp.maximum(sq_ref[...] * inv_n - mu * mu, 0.0)
    scale = g_ref[...] * jax.lax.rsqrt(var + EPS)
    shift = b_ref[...] - mu * scale
    o_ref[...] = jnp.maximum(y_ref[...] * scale + shift, 0.0)


def _bn_relu_add_kernel(inv_n, y_ref, sum_ref, sq_ref, g_ref, b_ref, skip_ref, o_ref):
    """Pass B (second conv): BN scale/shift + ReLU, fused residual add + final ReLU."""
    mu = sum_ref[...] * inv_n
    var = jnp.maximum(sq_ref[...] * inv_n - mu * mu, 0.0)
    scale = g_ref[...] * jax.lax.rsqrt(var + EPS)
    shift = b_ref[...] - mu * scale
    act = jnp.maximum(y_ref[...] * scale + shift, 0.0)
    o_ref[...] = jnp.maximum(act + skip_ref[...], 0.0)


# ----------------------------- pallas_call wrappers ------------------------- #
def _conv_stats(patches_bf16, w_bf16, tp):
    Ppad, Kpad = patches_bf16.shape
    Cpad = w_bf16.shape[1]
    grid = (Ppad // tp,)
    return pl.pallas_call(
        _conv_stats_kernel,
        out_shape=(jax.ShapeDtypeStruct((Ppad, Cpad), jnp.float32),
                   jax.ShapeDtypeStruct((1, Cpad), jnp.float32),
                   jax.ShapeDtypeStruct((1, Cpad), jnp.float32)),
        grid=grid,
        in_specs=[pl.BlockSpec((tp, Kpad), lambda i: (i, 0)),       # patch tile advances
                  pl.BlockSpec((Kpad, Cpad), lambda i: (0, 0))],    # weights stay resident
        out_specs=(pl.BlockSpec((tp, Cpad), lambda i: (i, 0)),
                   pl.BlockSpec((1, Cpad), lambda i: (0, 0)),       # stat accumulators
                   pl.BlockSpec((1, Cpad), lambda i: (0, 0))),
        compiler_params=pltpu.CompilerParams(dimension_semantics=("arbitrary",)),
    )(patches_bf16, w_bf16)


def _bn_relu(y, ssum, ssq, gamma, beta, n_rows, tp, skip=None):
    Ppad, Cpad = y.shape
    grid = (Ppad // tp,)
    args = [y, ssum, ssq, gamma, beta]
    specs = [pl.BlockSpec((tp, Cpad), lambda i: (i, 0)),
             pl.BlockSpec((1, Cpad), lambda i: (0, 0)),
             pl.BlockSpec((1, Cpad), lambda i: (0, 0)),
             pl.BlockSpec((1, Cpad), lambda i: (0, 0)),
             pl.BlockSpec((1, Cpad), lambda i: (0, 0))]
    kernel = functools.partial(_bn_relu_kernel, 1.0 / n_rows)
    if skip is not None:
        args.append(skip)
        specs.append(pl.BlockSpec((tp, Cpad), lambda i: (i, 0)))
        kernel = functools.partial(_bn_relu_add_kernel, 1.0 / n_rows)
    return pl.pallas_call(
        kernel,
        out_shape=jax.ShapeDtypeStruct((Ppad, Cpad), jnp.float32),
        grid=grid,
        in_specs=specs,
        out_specs=pl.BlockSpec((tp, Cpad), lambda i: (i, 0)),
        compiler_params=pltpu.CompilerParams(dimension_semantics=("parallel",)),
    )(*args)


# ------------------------------- JAX glue ---------------------------------- #
def _im2col(x_nhwc, ksize=3, stride=1, pad=1):
    N, H, W, C = x_nhwc.shape
    xp = jnp.pad(x_nhwc, ((0, 0), (pad, pad), (pad, pad), (0, 0)))
    Ho = (H + 2 * pad - ksize) // stride + 1
    Wo = (W + 2 * pad - ksize) // stride + 1
    cols = []
    for ky in range(ksize):
        for kx in range(ksize):
            cols.append(xp[:, ky:ky + stride * Ho:stride, kx:kx + stride * Wo:stride, :])
    patches = jnp.concatenate(cols, axis=-1)          # (N, Ho, Wo, 9*C), order [ky, kx, cin]
    return patches.reshape(N * Ho * Wo, ksize * ksize * C), (N, Ho, Wo)


def _prep_weight(w_ocrs, k_pad, c_pad):
    # PyTorch layout (Cout, Cin, kh, kw) -> (kh*kw*Cin, Cout), zero-padded, bf16 for the MXU.
    cout, cin, kh, kw = w_ocrs.shape
    w = jnp.transpose(w_ocrs, (2, 3, 1, 0)).reshape(kh * kw * cin, cout)
    w = jnp.pad(w, ((0, k_pad - kh * kw * cin), (0, c_pad - cout)))
    return w.astype(jnp.bfloat16)


def conv_bn_relu(x_nhwc, w_ocrs, bias_unused, gamma, beta, stride, skip_nhwc=None, tp=DEF_TP):
    """conv3x3 -> training-mode BN -> ReLU (optionally fused +skip, ReLU). Conv bias dropped:
    it is exactly cancelled by the BN mean subtraction (dead work)."""
    del bias_unused
    cout = w_ocrs.shape[0]
    patches, (N, Ho, Wo) = _im2col(x_nhwc, stride=stride)
    P, K = patches.shape

    k_pad = _round_up(K, LANE)
    c_pad = _round_up(cout, LANE)
    tile = min(tp, _round_up(P, 8))
    p_pad = _round_up(P, tile)

    patches = jnp.pad(patches, ((0, p_pad - P), (0, k_pad - K))).astype(jnp.bfloat16)
    w_mat = _prep_weight(w_ocrs, k_pad, c_pad)
    g2 = jnp.pad(gamma.reshape(1, cout), ((0, 0), (0, c_pad - cout))).astype(jnp.float32)
    b2 = jnp.pad(beta.reshape(1, cout), ((0, 0), (0, c_pad - cout))).astype(jnp.float32)

    # Pass A: matmul + global per-channel sum / sum-of-squares (padded rows contribute 0).
    y, ssum, ssq = _conv_stats(patches, w_mat, tile)

    skip_pad = None
    if skip_nhwc is not None:
        skip_flat = skip_nhwc.reshape(N * Ho * Wo, -1).astype(jnp.float32)
        skip_pad = jnp.pad(skip_flat, ((0, p_pad - P), (0, c_pad - skip_flat.shape[1])))

    # Pass B: normalize with real row count P (not padded), ReLU (+skip add +ReLU).
    out = _bn_relu(y, ssum, ssq, g2, b2, n_rows=P, tp=tile, skip=skip_pad)
    return out[:P, :cout].reshape(N, Ho, Wo, cout)


@functools.partial(jax.jit, static_argnames=("downsampling",))
def resnet_block_forward(x_nchw, params, downsampling=False):
    """Pallas implementation of ResNet_Block.forward (training-mode BatchNorm)."""
    x = jnp.transpose(x_nchw, (0, 2, 3, 1))  # NCHW -> NHWC
    stride = 2 if downsampling else 1

    if downsampling:
        skip = conv_bn_relu(x, *params["skip"], stride=2)
    else:
        skip = x  # torch.clone(x)

    h = conv_bn_relu(x, *params["conv1"], stride=stride)
    # second conv fused with residual add + final ReLU
    out = conv_bn_relu(h, *params["conv2"], stride=1, skip_nhwc=skip)
    return jnp.transpose(out, (0, 3, 1, 2))  # NHWC -> NCHW


# ---------------------------- pure-JAX reference ---------------------------- #
def _conv_bn_relu_ref(x_nhwc, w_ocrs, b, g, be, stride):
    y = jax.lax.conv_general_dilated(
        x_nhwc, jnp.transpose(w_ocrs, (2, 3, 1, 0)),  # -> HWIO
        window_strides=(stride, stride), padding=((1, 1), (1, 1)),
        dimension_numbers=("NHWC", "HWIO", "NHWC"))
    y = y + b.reshape(1, 1, 1, -1)
    mu = jnp.mean(y, axis=(0, 1, 2), keepdims=True)
    var = jnp.mean((y - mu) ** 2, axis=(0, 1, 2), keepdims=True)
    yhat = (y - mu) / jnp.sqrt(var + EPS)
    return jnp.maximum(yhat * g.reshape(1, 1, 1, -1) + be.reshape(1, 1, 1, -1), 0.0)


def resnet_block_ref(x_nchw, params, downsampling=False):
    x = jnp.transpose(x_nchw, (0, 2, 3, 1))
    stride = 2 if downsampling else 1
    skip = _conv_bn_relu_ref(x, *params["skip"], stride=2) if downsampling else x
    h = _conv_bn_relu_ref(x, *params["conv1"], stride=stride)
    h = _conv_bn_relu_ref(h, *params["conv2"], stride=1)
    out = jnp.maximum(h + skip, 0.0)
    return jnp.transpose(out, (0, 3, 1, 2))


# --------------------------------- params ----------------------------------- #
def make_params(key, in_channel, out_channel, downsampling):
    def conv_bn(key, cin, cout):
        k1, k2, k3, k4 = jax.random.split(key, 4)
        fan_in = cin * 9
        w = jax.random.normal(k1, (cout, cin, 3, 3), jnp.float32) * (fan_in ** -0.5)
        b = 0.01 * jax.random.normal(k2, (cout,), jnp.float32)
        g = 1.0 + 0.1 * jax.random.normal(k3, (cout,), jnp.float32)
        be = 0.1 * jax.random.normal(k4, (cout,), jnp.float32)
        return (w, b, g, be)

    ks = jax.random.split(key, 3)
    params = {
        "conv1": conv_bn(ks[0], in_channel, out_channel),
        "conv2": conv_bn(ks[1], out_channel, out_channel),
    }
    if downsampling:
        params["skip"] = conv_bn(ks[2], in_channel, out_channel)
    return params


# ---------------------------------- main ------------------------------------ #
if __name__ == "__main__":
    key = jax.random.PRNGKey(0)
    kx1, kx2, kp1, kp2 = jax.random.split(key, 4)

    # Case 1: no downsampling (in_channel == out_channel so residual add is valid)
    x1 = jax.random.normal(kx1, (2, 8, 16, 16), jnp.float32)      # NCHW
    p1 = make_params(kp1, 8, 8, downsampling=False)
    y1 = jax.block_until_ready(resnet_block_forward(x1, p1, downsampling=False))
    r1 = resnet_block_ref(x1, p1, downsampling=False)
    assert y1.shape == (2, 8, 16, 16)
    # bf16 MXU inputs (f32 accumulation + f32 BN) vs an all-f32 reference -> looser tolerance.
    assert jnp.allclose(y1, r1, atol=3e-2, rtol=3e-2), "mismatch (no downsampling)"

    # Case 2: downsampling (stride 2, skip conv path)
    x2 = jax.random.normal(kx2, (2, 4, 16, 16), jnp.float32)      # NCHW
    p2 = make_params(kp2, 4, 8, downsampling=True)
    y2 = jax.block_until_ready(resnet_block_forward(x2, p2, downsampling=True))
    r2 = resnet_block_ref(x2, p2, downsampling=True)
    assert y2.shape == (2, 8, 8, 8)
    assert jnp.allclose(y2, r2, atol=3e-2, rtol=3e-2), "mismatch (downsampling)"

    print("KERNEL_OK")
</pallas_src>

<mosaic_0001>
module attributes {stable_mosaic.version = 11 : i64} {
  func.func @_conv_stats_kernel(%arg0: i32, %arg1: memref<256x128xbf16, #tpu.memory_space<vmem>>, %arg2: memref<128x128xbf16, #tpu.memory_space<vmem>>, %arg3: memref<256x128xf32, #tpu.memory_space<vmem>>, %arg4: memref<1x128xf32, #tpu.memory_space<vmem>>, %arg5: memref<1x128xf32, #tpu.memory_space<vmem>>) attributes {dimension_semantics = [#tpu.dimension_semantics<arbitrary>], iteration_bounds = array<i64: 2>, scalar_prefetch = 0 : i64, scratch_operands = 0 : i64, tpu.core_type = #tpu.core_type<tc>, window_params = [{transform_indices = @transform_0, window_bounds = array<i64: 256, 128>}, {pipeline_mode = #tpu.pipeline_mode<synchronous>, transform_indices = @transform_1, window_bounds = array<i64: 128, 128>}, {transform_indices = @transform_2, window_bounds = array<i64: 256, 128>}, {pipeline_mode = #tpu.pipeline_mode<synchronous>, transform_indices = @transform_3, window_bounds = array<i64: 1, 128>}, {pipeline_mode = #tpu.pipeline_mode<synchronous>, transform_indices = @transform_4, window_bounds = array<i64: 1, 128>}]} {
    %c0_i32 = arith.constant 0 : i32
    %0 = arith.cmpi eq, %arg0, %c0_i32 : i32
    %1 = arith.extui %0 : i1 to i32
    %c0_i32_0 = arith.constant 0 : i32
    %2 = arith.cmpi ne, %1, %c0_i32_0 : i32
    scf.if %2 {
      %cst_16 = arith.constant 0.000000e+00 : f32
      %18 = vector.broadcast %cst_16 : f32 to vector<1x128xf32>
      %c0_17 = arith.constant 0 : index
      %c0_18 = arith.constant 0 : index
      %19 = vector.load %arg4[%c0_17, %c0_18] : memref<1x128xf32, #tpu.memory_space<vmem>>, vector<1x128xf32>
      tpu.vector_store %arg4[%c0_17, %c0_18], %18 {strides = array<i32>} : memref<1x128xf32, #tpu.memory_space<vmem>>, vector<1x128xf32>,
      %cst_19 = arith.constant 0.000000e+00 : f32
      %20 = vector.broadcast %cst_19 : f32 to vector<1x128xf32>
      %c0_20 = arith.constant 0 : index
      %c0_21 = arith.constant 0 : index
      %21 = vector.load %arg5[%c0_20, %c0_21] : memref<1x128xf32, #tpu.memory_space<vmem>>, vector<1x128xf32>
      tpu.vector_store %arg5[%c0_20, %c0_21], %20 {strides = array<i32>} : memref<1x128xf32, #tpu.memory_space<vmem>>, vector<1x128xf32>,
    } else {
    }
    %c0 = arith.constant 0 : index
    %c0_1 = arith.constant 0 : index
    %3 = vector.load %arg1[%c0, %c0_1] : memref<256x128xbf16, #tpu.memory_space<vmem>>, vector<256x128xbf16>
    %c0_2 = arith.constant 0 : index
    %c0_3 = arith.constant 0 : index
    %4 = vector.load %arg2[%c0_2, %c0_3] : memref<128x128xbf16, #tpu.memory_space<vmem>>, vector<128x128xbf16>
    %cst = arith.constant dense<0.000000e+00> : vector<256x128xf32>
    %5 = tpu.matmul %3, %4, %cst {dimension_numbers = #tpu.dot_dimension_numbers<[1], [0], [0], [1], [0, 0, 1, 1], [], []>} : vector<256x128xbf16>, vector<128x128xbf16>, vector<256x128xf32> -> vector<256x128xf32>
    %c0_4 = arith.constant 0 : index
    %c0_5 = arith.constant 0 : index
    %6 = vector.load %arg3[%c0_4, %c0_5] : memref<256x128xf32, #tpu.memory_space<vmem>>, vector<256x128xf32>
    tpu.vector_store %arg3[%c0_4, %c0_5], %5 {strides = array<i32>} : memref<256x128xf32, #tpu.memory_space<vmem>>, vector<256x128xf32>,
    %c0_6 = arith.constant 0 : index
    %c0_7 = arith.constant 0 : index
    %7 = vector.load %arg4[%c0_6, %c0_7] : memref<1x128xf32, #tpu.memory_space<vmem>>, vector<1x128xf32>
    %cst_8 = arith.constant dense<0.000000e+00> : vector<128xf32>
    %8 = vector.multi_reduction <add>, %5, %cst_8 [0] : vector<256x128xf32> to vector<128xf32>
    %9 = vector.shape_cast %8 : vector<128xf32> to vector<1x128xf32>
    %10 = arith.addf %7, %9 : vector<1x128xf32>
    %c0_9 = arith.constant 0 : index
    %c0_10 = arith.constant 0 : index
    %11 = vector.load %arg4[%c0_9, %c0_10] : memref<1x128xf32, #tpu.memory_space<vmem>>, vector<1x128xf32>
    tpu.vector_store %arg4[%c0_9, %c0_10], %10 {strides = array<i32>} : memref<1x128xf32, #tpu.memory_space<vmem>>, vector<1x128xf32>,
    %c0_11 = arith.constant 0 : index
    %c0_12 = arith.constant 0 : index
    %12 = vector.load %arg5[%c0_11, %c0_12] : memref<1x128xf32, #tpu.memory_space<vmem>>, vector<1x128xf32>
    %13 = arith.mulf %5, %5 : vector<256x128xf32>
    %cst_13 = arith.constant dense<0.000000e+00> : vector<128xf32>
    %14 = vector.multi_reduction <add>, %13, %cst_13 [0] : vector<256x128xf32> to vector<128xf32>
    %15 = vector.shape_cast %14 : vector<128xf32> to vector<1x128xf32>
    %16 = arith.addf %12, %15 : vector<1x128xf32>
    %c0_14 = arith.constant 0 : index
    %c0_15 = arith.constant 0 : index
    %17 = vector.load %arg5[%c0_14, %c0_15] : memref<1x128xf32, #tpu.memory_space<vmem>>, vector<1x128xf32>
    tpu.vector_store %arg5[%c0_14, %c0_15], %16 {strides = array<i32>} : memref<1x128xf32, #tpu.memory_space<vmem>>, vector<1x128xf32>,
    return
  }
  func.func @transform_0(%arg0: i32) -> (i32, i32) {
    %c0_i32 = arith.constant 0 : i32
    %c0_i32_0 = arith.constant 0 : i32
    return %arg0, %c0_i32 : i32, i32
  }
  func.func @transform_1(%arg0: i32) -> (i32, i32) {
    %c0_i32 = arith.constant 0 : i32
    %c0_i32_0 = arith.constant 0 : i32
    %c0_i32_1 = arith.constant 0 : i32
    return %c0_i32, %c0_i32_0 : i32, i32
  }
  func.func @transform_2(%arg0: i32) -> (i32, i32) {
    %c0_i32 = arith.constant 0 : i32
    %c0_i32_0 = arith.constant 0 : i32
    return %arg0, %c0_i32 : i32, i32
  }
  func.func @transform_3(%arg0: i32) -> (i32, i32) {
    %c0_i32 = arith.constant 0 : i32
    %c0_i32_0 = arith.constant 0 : i32
    %c0_i32_1 = arith.constant 0 : i32
    return %c0_i32, %c0_i32_0 : i32, i32
  }
  func.func @transform_4(%arg0: i32) -> (i32, i32) {
    %c0_i32 = arith.constant 0 : i32
    %c0_i32_0 = arith.constant 0 : i32
    %c0_i32_1 = arith.constant 0 : i32
    return %c0_i32, %c0_i32_0 : i32, i32
  }
}

module attributes {stable_mosaic.version = 11 : i64} {
  func.func @_bn_relu_kernel(%arg0: i32, %arg1: memref<256x128xf32, #tpu.memory_space<vmem>>, %arg2: memref<1x128xf32, #tpu.memory_space<vmem>>, %arg3: memref<1x128xf32, #tpu.memory_space<vmem>>, %arg4: memref<1x128xf32, #tpu.memory_space<vmem>>, %arg5: memref<1x128xf32, #tpu.memory_space<vmem>>, %arg6: memref<256x128xf32, #tpu.memory_space<vmem>>) attributes {dimension_semantics = [#tpu.dimension_semantics<parallel>], iteration_bounds = array<i64: 2>, scalar_prefetch = 0 : i64, scratch_operands = 0 : i64, tpu.core_type = #tpu.core_type<tc>, window_params = [{transform_indices = @transform_0, window_bounds = array<i64: 256, 128>}, {pipeline_mode = #tpu.pipeline_mode<synchronous>, transform_indices = @transform_1, window_bounds = array<i64: 1, 128>}, {pipeline_mode = #tpu.pipeline_mode<synchronous>, transform_indices = @transform_2, window_bounds = array<i64: 1, 128>}, {pipeline_mode = #tpu.pipeline_mode<synchronous>, transform_indices = @transform_3, window_bounds = array<i64: 1, 128>}, {pipeline_mode = #tpu.pipeline_mode<synchronous>, transform_indices = @transform_4, window_bounds = array<i64: 1, 128>}, {transform_indices = @transform_5, window_bounds = array<i64: 256, 128>}]} {
    %c0 = arith.constant 0 : index
    %c0_0 = arith.constant 0 : index
    %0 = vector.load %arg2[%c0, %c0_0] : memref<1x128xf32, #tpu.memory_space<vmem>>, vector<1x128xf32>
    %cst = arith.constant 0.001953125 : f32
    %1 = vector.broadcast %cst : f32 to vector<1x128xf32>
    %2 = arith.mulf %0, %1 : vector<1x128xf32>
    %c0_1 = arith.constant 0 : index
    %c0_2 = arith.constant 0 : index
    %3 = vector.load %arg3[%c0_1, %c0_2] : memref<1x128xf32, #tpu.memory_space<vmem>>, vector<1x128xf32>
    %cst_3 = arith.constant 0.001953125 : f32
    %4 = vector.broadcast %cst_3 : f32 to vector<1x128xf32>
    %5 = arith.mulf %3, %4 : vector<1x128xf32>
    %6 = arith.mulf %2, %2 : vector<1x128xf32>
    %7 = arith.subf %5, %6 : vector<1x128xf32>
    %cst_4 = arith.constant 0.000000e+00 : f32
    %8 = vector.broadcast %cst_4 : f32 to vector<1x128xf32>
    %9 = arith.maximumf %7, %8 : vector<1x128xf32>
    %c0_5 = arith.constant 0 : index
    %c0_6 = arith.constant 0 : index
    %10 = vector.load %arg4[%c0_5, %c0_6] : memref<1x128xf32, #tpu.memory_space<vmem>>, vector<1x128xf32>
    %cst_7 = arith.constant 9.99999974E-6 : f32
    %11 = vector.broadcast %cst_7 : f32 to vector<1x128xf32>
    %12 = arith.addf %9, %11 : vector<1x128xf32>
    %13 = math.rsqrt %12 : vector<1x128xf32>
    %14 = arith.mulf %10, %13 : vector<1x128xf32>
    %c0_8 = arith.constant 0 : index
    %c0_9 = arith.constant 0 : index
    %15 = vector.load %arg5[%c0_8, %c0_9] : memref<1x128xf32, #tpu.memory_space<vmem>>, vector<1x128xf32>
    %16 = arith.mulf %2, %14 : vector<1x128xf32>
    %17 = arith.subf %15, %16 : vector<1x128xf32>
    %c0_10 = arith.constant 0 : index
    %c0_11 = arith.constant 0 : index
    %18 = vector.load %arg1[%c0_10, %c0_11] : memref<256x128xf32, #tpu.memory_space<vmem>>, vector<256x128xf32>
    %19 = vector.broadcast %14 : vector<1x128xf32> to vector<256x128xf32>
    %20 = arith.mulf %18, %19 : vector<256x128xf32>
    %21 = vector.broadcast %17 : vector<1x128xf32> to vector<256x128xf32>
    %22 = arith.addf %20, %21 : vector<256x128xf32>
    %cst_12 = arith.constant 0.000000e+00 : f32
    %23 = vector.broadcast %cst_12 : f32 to vector<256x128xf32>
    %24 = arith.maximumf %22, %23 : vector<256x128xf32>
    %c0_13 = arith.constant 0 : index
    %c0_14 = arith.constant 0 : index
    %25 = vector.load %arg6[%c0_13, %c0_14] : memref<256x128xf32, #tpu.memory_space<vmem>>, vector<256x128xf32>
    tpu.vector_store %arg6[%c0_13, %c0_14], %24 {strides = array<i32>} : memref<256x128xf32, #tpu.memory_space<vmem>>, vector<256x128xf32>,
    return
  }
  func.func @transform_0(%arg0: i32) -> (i32, i32) {
    %c0_i32 = arith.constant 0 : i32
    %c0_i32_0 = arith.constant 0 : i32
    return %arg0, %c0_i32 : i32, i32
  }
  func.func @transform_1(%arg0: i32) -> (i32, i32) {
    %c0_i32 = arith.constant 0 : i32
    %c0_i32_0 = arith.constant 0 : i32
    %c0_i32_1 = arith.constant 0 : i32
    return %c0_i32, %c0_i32_0 : i32, i32
  }
  func.func @transform_2(%arg0: i32) -> (i32, i32) {
    %c0_i32 = arith.constant 0 : i32
    %c0_i32_0 = arith.constant 0 : i32
    %c0_i32_1 = arith.constant 0 : i32
    return %c0_i32, %c0_i32_0 : i32, i32
  }
  func.func @transform_3(%arg0: i32) -> (i32, i32) {
    %c0_i32 = arith.constant 0 : i32
    %c0_i32_0 = arith.constant 0 : i32
    %c0_i32_1 = arith.constant 0 : i32
    return %c0_i32, %c0_i32_0 : i32, i32
  }
  func.func @transform_4(%arg0: i32) -> (i32, i32) {
    %c0_i32 = arith.constant 0 : i32
    %c0_i32_0 = arith.constant 0 : i32
    %c0_i32_1 = arith.constant 0 : i32
    return %c0_i32, %c0_i32_0 : i32, i32
  }
  func.func @transform_5(%arg0: i32) -> (i32, i32) {
    %c0_i32 = arith.constant 0 : i32
    %c0_i32_0 = arith.constant 0 : i32
    return %arg0, %c0_i32 : i32, i32
  }
}

module attributes {stable_mosaic.version = 11 : i64} {
  func.func @_bn_relu_add_kernel(%arg0: i32, %arg1: memref<256x128xf32, #tpu.memory_space<vmem>>, %arg2: memref<1x128xf32, #tpu.memory_space<vmem>>, %arg3: memref<1x128xf32, #tpu.memory_space<vmem>>, %arg4: memref<1x128xf32, #tpu.memory_space<vmem>>, %arg5: memref<1x128xf32, #tpu.memory_space<vmem>>, %arg6: memref<256x128xf32, #tpu.memory_space<vmem>>, %arg7: memref<256x128xf32, #tpu.memory_space<vmem>>) attributes {dimension_semantics = [#tpu.dimension_semantics<parallel>], iteration_bounds = array<i64: 2>, scalar_prefetch = 0 : i64, scratch_operands = 0 : i64, tpu.core_type = #tpu.core_type<tc>, window_params = [{transform_indices = @transform_0, window_bounds = array<i64: 256, 128>}, {pipeline_mode = #tpu.pipeline_mode<synchronous>, transform_indices = @transform_1, window_bounds = array<i64: 1, 128>}, {pipeline_mode = #tpu.pipeline_mode<synchronous>, transform_indices = @transform_2, window_bounds = array<i64: 1, 128>}, {pipeline_mode = #tpu.pipeline_mode<synchronous>, transform_indices = @transform_3, window_bounds = array<i64: 1, 128>}, {pipeline_mode = #tpu.pipeline_mode<synchronous>, transform_indices = @transform_4, window_bounds = array<i64: 1, 128>}, {transform_indices = @transform_5, window_bounds = array<i64: 256, 128>}, {transform_indices = @transform_6, window_bounds = array<i64: 256, 128>}]} {
    %c0 = arith.constant 0 : index
    %c0_0 = arith.constant 0 : index
    %0 = vector.load %arg2[%c0, %c0_0] : memref<1x128xf32, #tpu.memory_space<vmem>>, vector<1x128xf32>
    %cst = arith.constant 0.001953125 : f32
    %1 = vector.broadcast %cst : f32 to vector<1x128xf32>
    %2 = arith.mulf %0, %1 : vector<1x128xf32>
    %c0_1 = arith.constant 0 : index
    %c0_2 = arith.constant 0 : index
    %3 = vector.load %arg3[%c0_1, %c0_2] : memref<1x128xf32, #tpu.memory_space<vmem>>, vector<1x128xf32>
    %cst_3 = arith.constant 0.001953125 : f32
    %4 = vector.broadcast %cst_3 : f32 to vector<1x128xf32>
    %5 = arith.mulf %3, %4 : vector<1x128xf32>
    %6 = arith.mulf %2, %2 : vector<1x128xf32>
    %7 = arith.subf %5, %6 : vector<1x128xf32>
    %cst_4 = arith.constant 0.000000e+00 : f32
    %8 = vector.broadcast %cst_4 : f32 to vector<1x128xf32>
    %9 = arith.maximumf %7, %8 : vector<1x128xf32>
    %c0_5 = arith.constant 0 : index
    %c0_6 = arith.constant 0 : index
    %10 = vector.load %arg4[%c0_5, %c0_6] : memref<1x128xf32, #tpu.memory_space<vmem>>, vector<1x128xf32>
    %cst_7 = arith.constant 9.99999974E-6 : f32
    %11 = vector.broadcast %cst_7 : f32 to vector<1x128xf32>
    %12 = arith.addf %9, %11 : vector<1x128xf32>
    %13 = math.rsqrt %12 : vector<1x128xf32>
    %14 = arith.mulf %10, %13 : vector<1x128xf32>
    %c0_8 = arith.constant 0 : index
    %c0_9 = arith.constant 0 : index
    %15 = vector.load %arg5[%c0_8, %c0_9] : memref<1x128xf32, #tpu.memory_space<vmem>>, vector<1x128xf32>
    %16 = arith.mulf %2, %14 : vector<1x128xf32>
    %17 = arith.subf %15, %16 : vector<1x128xf32>
    %c0_10 = arith.constant 0 : index
    %c0_11 = arith.constant 0 : index
    %18 = vector.load %arg1[%c0_10, %c0_11] : memref<256x128xf32, #tpu.memory_space<vmem>>, vector<256x128xf32>
    %19 = vector.broadcast %14 : vector<1x128xf32> to vector<256x128xf32>
    %20 = arith.mulf %18, %19 : vector<256x128xf32>
    %21 = vector.broadcast %17 : vector<1x128xf32> to vector<256x128xf32>
    %22 = arith.addf %20, %21 : vector<256x128xf32>
    %cst_12 = arith.constant 0.000000e+00 : f32
    %23 = vector.broadcast %cst_12 : f32 to vector<256x128xf32>
    %24 = arith.maximumf %22, %23 : vector<256x128xf32>
    %c0_13 = arith.constant 0 : index
    %c0_14 = arith.constant 0 : index
    %25 = vector.load %arg6[%c0_13, %c0_14] : memref<256x128xf32, #tpu.memory_space<vmem>>, vector<256x128xf32>
    %26 = arith.addf %24, %25 : vector<256x128xf32>
    %cst_15 = arith.constant 0.000000e+00 : f32
    %27 = vector.broadcast %cst_15 : f32 to vector<256x128xf32>
    %28 = arith.maximumf %26, %27 : vector<256x128xf32>
    %c0_16 = arith.constant 0 : index
    %c0_17 = arith.constant 0 : index
    %29 = vector.load %arg7[%c0_16, %c0_17] : memref<256x128xf32, #tpu.memory_space<vmem>>, vector<256x128xf32>
    tpu.vector_store %arg7[%c0_16, %c0_17], %28 {strides = array<i32>} : memref<256x128xf32, #tpu.memory_space<vmem>>, vector<256x128xf32>,
    return
  }
  func.func @transform_0(%arg0: i32) -> (i32, i32) {
    %c0_i32 = arith.constant 0 : i32
    %c0_i32_0 = arith.constant 0 : i32
    return %arg0, %c0_i32 : i32, i32
  }
  func.func @transform_1(%arg0: i32) -> (i32, i32) {
    %c0_i32 = arith.constant 0 : i32
    %c0_i32_0 = arith.constant 0 : i32
    %c0_i32_1 = arith.constant 0 : i32
    return %c0_i32, %c0_i32_0 : i32, i32
  }
  func.func @transform_2(%arg0: i32) -> (i32, i32) {
    %c0_i32 = arith.constant 0 : i32
    %c0_i32_0 = arith.constant 0 : i32
    %c0_i32_1 = arith.constant 0 : i32
    return %c0_i32, %c0_i32_0 : i32, i32
  }
  func.func @transform_3(%arg0: i32) -> (i32, i32) {
    %c0_i32 = arith.constant 0 : i32
    %c0_i32_0 = arith.constant 0 : i32
    %c0_i32_1 = arith.constant 0 : i32
    return %c0_i32, %c0_i32_0 : i32, i32
  }
  func.func @transform_4(%arg0: i32) -> (i32, i32) {
    %c0_i32 = arith.constant 0 : i32
    %c0_i32_0 = arith.constant 0 : i32
    %c0_i32_1 = arith.constant 0 : i32
    return %c0_i32, %c0_i32_0 : i32, i32
  }
  func.func @transform_5(%arg0: i32) -> (i32, i32) {
    %c0_i32 = arith.constant 0 : i32
    %c0_i32_0 = arith.constant 0 : i32
    return %arg0, %c0_i32 : i32, i32
  }
  func.func @transform_6(%arg0: i32) -> (i32, i32) {
    %c0_i32 = arith.constant 0 : i32
    %c0_i32_0 = arith.constant 0 : i32
    return %arg0, %c0_i32 : i32, i32
  }
}

</mosaic_0001>

<bundles_post_ra>
// kernel: resnet_block_forward.5
= control target key start
LH: loop header
LB: loop body
LE: loop exit
PB: predicated region body
PF: predicated region fallthrough
CT: control target
= control target key end

     0   :  { %s532_s18 = smov 0   ;;  %s704_s0 = inlined_call_operand.vmem [shape: f32[512,128], index: 0, kind: input, shape index: {}]   ;;  %s705_s1 = inlined_call_operand.vmem [shape: f32[1,128], index: 1, kind: input, shape index: {}]   ;;  %s706_s2 = inlined_call_operand.vmem [shape: f32[1,128], index: 2, kind: input, shape index: {}]   ;;  %s707_s3 = inlined_call_operand.vmem [shape: f32[1,128], index: 3, kind: input, shape index: {}]   ;;  %s708_s4 = inlined_call_operand.vmem [shape: f32[1,128], index: 4, kind: input, shape index: {}]   ;;  %s709_s5 = inlined_call_operand.vmem [shape: f32[512,128], index: 5, kind: output, shape index: {}]  }
   0x1 LB: > { %s473_s19 = sadd.s32 4294967295, %s500_s18   ;;  %p477_p0 = scmp.ge.s32.totalorder %s500_s18, 1  ;;  %s500_s18 = sphi %s532_s18, %s15_s18  }
   0x2   : > { %p188_p1 = scmp.lt.s32.totalorder %s500_s18, 3 }
   0x4   : > { %p189_p2 = pnand %p477_p0, %p188_p1 }
   0x5   : > { %s478_s24 = sshll.u32 (!%p189_p2), %s473_s19, 5 }
   0x6   : > { %192 = sbr.rel (%p189_p2) target bundleno = 84 (0x54), region = 40  ;;  %p217_p3 = scmp.lt.s32.totalorder (!%p189_p2), %s478_s24, 63 }
   0xb   : > { %v228_v0 = vld [vmem:[%s705_s1] sm:$0x1]  ;;  %s711_s24 = smov (!%p217_p3, %s478_s24), 63 }
   0xc   : > { %v230_v1 = vld [vmem:[%s706_s2] sm:$0x1]  ;;  %v229_v2 = vmul.f32 0.001953125, %v228_v0  ;;  %s479_s25 = sshll.u32 %s711_s24, 3 }
   0xd   : > { %v231_v3 = vmul.f32 0.001953125, %v230_v1  ;;  %v235_v13 = vld [vmem:[%s707_s3] sm:$0x1]  ;;  %s557_s30 = scalar_lea.vmem %s704_s0, %s479_s25  ;;  %s596_s10 = scalar_lea.vmem %s709_s5, %s479_s25 }
   0xe   : > { %v232_v4 = vmul.f32 %v229_v2, %v229_v2  ;;  %v248_v17 = vld [vmem:[%s708_s4] sm:$0x1]  ;;  %v252_v19 = vld [vmem:[%s557_s30 + $0x8] sm:$0xff]  ;;  %v253_v20 = vld [vmem:[%s557_s30 + $0x10] sm:$0xff] }
   0xf   : > { %v251_v18 = vld [vmem:[%s557_s30] sm:$0xff]  ;;  %v254_v23 = vld [vmem:[%s557_s30 + $0x18] sm:$0xff]  ;;  %v256_v25 = vld [vmem:[%s557_s30 + $0x28] sm:$0xff] }
  0x10   : > { %v233_v5 = vsub.f32 %v231_v3, %v232_v4  ;;  %v255_v24 = vld [vmem:[%s557_s30 + $0x20] sm:$0xff]  ;;  %v257_v26 = vld [vmem:[%s557_s30 + $0x30] sm:$0xff]  ;;  %v258_v31 = vld [vmem:[%s557_s30 + $0x38] sm:$0xff] }
  0x11   : > { %v259_v32 = vld [vmem:[%s557_s30 + $0x40] sm:$0xff]  ;;  %v260_v38 = vld [vmem:[%s557_s30 + $0x48] sm:$0xff]  ;;  %v261_v39 = vld [vmem:[%s557_s30 + $0x50] sm:$0xff] }
  0x12   : > { %v234_v6 = vmax.f32 %v233_v5, 0.0  ;;  %v262_v46 = vld [vmem:[%s557_s30 + $0x58] sm:$0xff]  ;;  %v263_v51 = vld [vmem:[%s557_s30 + $0x60] sm:$0xff]  ;;  %v264_v56 = vld [vmem:[%s557_s30 + $0x68] sm:$0xff] }
  0x13   : > { %v265_v60 = vld [vmem:[%s557_s30 + $0x70] sm:$0xff]  ;;  %v266_v0 = vld [vmem:[%s557_s30 + $0x78] sm:$0xff]  ;;  %v267_v4 = vld [vmem:[%s557_s30 + $0x80] sm:$0xff] }
  0x14   : > { %v236_v7 = vadd.f32 1e-05, %v234_v6 }
  0x16   : > { %492 = vrsqrt.f32 %v236_v7  ;;  %vm243_vm0 = vweird.f32 %v236_v7 }
  0x1c   : > { %v493_v8 = vpop.eup %492 }
  0x1d   : > { %v238_v9 = vmul.f32 %v493_v8, %v236_v7  ;;  %vm244_vm1 = vweird.f32 %v493_v8 }
  0x1e   : > { %vm245_vm2 = vmor %vm243_vm0, %vm244_vm1 }
  0x1f   : > { %v239_v10 = vmul.f32 %v493_v8, %v238_v9 }
  0x21   : > { %v240_v11 = vmul.f32 0.5, %v239_v10 }
  0x23   : > { %v241_v12 = vsub.f32 1.5, %v240_v11 }
  0x25   : > { %v242_v14 = vmul.f32 %v493_v8, %v241_v12  ;;  %v269_v12 = vld [vmem:[%s557_s30 + $0x90] sm:$0xff] }
  0x27   : > { %v246_v15 = vsel %vm245_vm2, %v493_v8, %v242_v14  ;;  %v268_v8 = vld [vmem:[%s557_s30 + $0x88] sm:$0xff] }
  0x28   : > { %v247_v16 = vmul.f32 %v246_v15, %v235_v13 }
  0x2a   : > { %v249_v21 = vmul.f32 %v247_v16, %v229_v2  ;;  %v565_v22 = vperm.slane %v247_v16, 0  ;;  %v270_v16 = vld [vmem:[%s557_s30 + $0x98] sm:$0xff] }
  0x2c   : > { %v250_v27 = vsub.f32 %v248_v17, %v249_v21  ;;  %v286_v28 = vmul.f32 %v565_v22, %v251_v18  ;;  %v287_v29 = vmul.f32 %v565_v22, %v252_v19  ;;  %v288_v30 = vmul.f32 %v565_v22, %v253_v20  ;;  %v271_v20 = vld [vmem:[%s557_s30 + $0xa0] sm:$0xff] }
  0x2d   : > { %v289_v33 = vmul.f32 %v565_v22, %v254_v23  ;;  %v290_v34 = vmul.f32 %v565_v22, %v255_v24  ;;  %v291_v35 = vmul.f32 %v565_v22, %v256_v25  ;;  %v292_v37 = vmul.f32 %v565_v22, %v257_v26  ;;  %v272_v25 = vld [vmem:[%s557_s30 + $0xa8] sm:$0xff] }
  0x2e   : > { %v579_v36 = vperm.slane %v250_v27, 0  ;;  %v293_v40 = vmul.f32 %v565_v22, %v258_v31  ;;  %v294_v41 = vmul.f32 %v565_v22, %v259_v32  ;;  %v295_v49 = vmul.f32 %v565_v22, %v260_v38  ;;  %v275_v38 = vld [vmem:[%s557_s30 + $0xc0] sm:$0xff] }
  0x2f   : > { %v296_v50 = vmul.f32 %v565_v22, %v261_v39  ;;  %v297_v59 = vmul.f32 %v565_v22, %v262_v46  ;;  %v298_v63 = vmul.f32 %v565_v22, %v263_v51  ;;  %v299_v3 = vmul.f32 %v565_v22, %v264_v56  ;;  %v277_v46 = vld [vmem:[%s557_s30 + $0xd0] sm:$0xff] }
  0x30   : > { %v321_v42 = vadd.f32 %v579_v36, %v286_v28  ;;  %v322_v43 = vadd.f32 %v579_v36, %v287_v29  ;;  %v323_v44 = vadd.f32 %v579_v36, %v288_v30  ;;  %v324_v45 = vadd.f32 %v579_v36, %v289_v33  ;;  %v273_v29 = vld [vmem:[%s557_s30 + $0xb0] sm:$0xff]  ;;  %v274_v33 = vld [vmem:[%s557_s30 + $0xb8] sm:$0xff] }
  0x31   : > { %v325_v47 = vadd.f32 %v579_v36, %v290_v34  ;;  %v326_v48 = vadd.f32 %v579_v36, %v291_v35  ;;  %v327_v55 = vadd.f32 %v579_v36, %v292_v37  ;;  %v328_v58 = vadd.f32 %v579_v36, %v293_v40 }
  0x32   : > { %v353_v52 = vmax.f32 %v321_v42, 0.0  ;;  %v354_v53 = vmax.f32 %v322_v43, 0.0  ;;  %v355_v54 = vmax.f32 %v323_v44, 0.0  ;;  %v356_v57 = vmax.f32 %v324_v45, 0.0  ;;  %v276_v42 = vld [vmem:[%s557_s30 + $0xc8] sm:$0xff] }
  0x33   : > { %v357_v61 = vmax.f32 %v325_v47, 0.0  ;;  %v329_v62 = vadd.f32 %v579_v36, %v294_v41  ;;  %v358_v1 = vmax.f32 %v326_v48, 0.0  ;;  %v330_v2 = vadd.f32 %v579_v36, %v295_v49 }
  0x34   : > { %385 = vst [vmem:[%s596_s10] sm:$0xff] %v353_v52  ;;  %v359_v5 = vmax.f32 %v327_v55, 0.0  ;;  %v331_v6 = vadd.f32 %v579_v36, %v296_v50  ;;  %v300_v7 = vmul.f32 %v565_v22, %v265_v60  ;;  %v360_v9 = vmax.f32 %v328_v58, 0.0  ;;  %v278_v50 = vld [vmem:[%s557_s30 + $0xd8] sm:$0xff]  ;;  %v280_v58 = vld [vmem:[%s557_s30 + $0xe8] sm:$0xff] }
  0x35   : > { %386 = vst [vmem:[%s596_s10 + $0x8] sm:$0xff] %v354_v53  ;;  %v332_v10 = vadd.f32 %v579_v36, %v297_v59  ;;  %v301_v11 = vmul.f32 %v565_v22, %v266_v0  ;;  %v361_v13 = vmax.f32 %v329_v62, 0.0  ;;  %v333_v14 = vadd.f32 %v579_v36, %v298_v63  ;;  %v281_v62 = vld [vmem:[%s557_s30 + $0xf0] sm:$0xff] }
  0x36   : > { %387 = vst [vmem:[%s596_s10 + $0x10] sm:$0xff] %v355_v54  ;;  %v302_v15 = vmul.f32 %v565_v22, %v267_v4  ;;  %v362_v17 = vmax.f32 %v330_v2, 0.0  ;;  %v334_v18 = vadd.f32 %v579_v36, %v299_v3  ;;  %v303_v19 = vmul.f32 %v565_v22, %v268_v8  ;;  %v279_v54 = vld [vmem:[%s557_s30 + $0xe0] sm:$0xff]  ;;  %v282_v2 = vld [vmem:[%s557_s30 + $0xf8] sm:$0xff] }
  0x37   : > { %388 = vst [vmem:[%s596_s10 + $0x18] sm:$0xff] %v356_v57  ;;  %v363_v21 = vmax.f32 %v331_v6, 0.0  ;;  %v335_v23 = vadd.f32 %v579_v36, %v300_v7  ;;  %v304_v24 = vmul.f32 %v565_v22, %v269_v12  ;;  %v364_v26 = vmax.f32 %v332_v10, 0.0 }
  0x38   : > { %389 = vst [vmem:[%s596_s10 + $0x20] sm:$0xff] %v357_v61  ;;  %v336_v27 = vadd.f32 %v579_v36, %v301_v11  ;;  %v305_v28 = vmul.f32 %v565_v22, %v270_v16  ;;  %v365_v30 = vmax.f32 %v333_v14, 0.0  ;;  %v337_v31 = vadd.f32 %v579_v36, %v302_v15 }
  0x39   : > { %390 = vst [vmem:[%s596_s10 + $0x28] sm:$0xff] %v358_v1  ;;  %v306_v32 = vmul.f32 %v565_v22, %v271_v20  ;;  %v366_v34 = vmax.f32 %v334_v18, 0.0  ;;  %v338_v35 = vadd.f32 %v579_v36, %v303_v19  ;;  %v307_v37 = vmul.f32 %v565_v22, %v272_v25 }
  0x3a   : > { %391 = vst [vmem:[%s596_s10 + $0x30] sm:$0xff] %v359_v5  ;;  %v367_v39 = vmax.f32 %v335_v23, 0.0  ;;  %v339_v40 = vadd.f32 %v579_v36, %v304_v24  ;;  %v308_v41 = vmul.f32 %v565_v22, %v273_v29  ;;  %v368_v43 = vmax.f32 %v336_v27, 0.0 }
  0x3b   : > { %392 = vst [vmem:[%s596_s10 + $0x38] sm:$0xff] %v360_v9  ;;  %v340_v44 = vadd.f32 %v579_v36, %v305_v28  ;;  %v309_v45 = vmul.f32 %v565_v22, %v274_v33  ;;  %v369_v47 = vmax.f32 %v337_v31, 0.0  ;;  %v341_v48 = vadd.f32 %v579_v36, %v306_v32 }
  0x3c   : > { %393 = vst [vmem:[%s596_s10 + $0x40] sm:$0xff] %v361_v13  ;;  %v310_v49 = vmul.f32 %v565_v22, %v275_v38  ;;  %v370_v51 = vmax.f32 %v338_v35, 0.0  ;;  %v342_v52 = vadd.f32 %v579_v36, %v307_v37  ;;  %v311_v53 = vmul.f32 %v565_v22, %v276_v42 }
  0x3d   : > { %394 = vst [vmem:[%s596_s10 + $0x48] sm:$0xff] %v362_v17  ;;  %v371_v55 = vmax.f32 %v339_v40, 0.0  ;;  %v343_v56 = vadd.f32 %v579_v36, %v308_v41  ;;  %v312_v57 = vmul.f32 %v565_v22, %v277_v46  ;;  %v372_v59 = vmax.f32 %v340_v44, 0.0 }
  0x3e   : > { %395 = vst [vmem:[%s596_s10 + $0x50] sm:$0xff] %v363_v21  ;;  %v344_v60 = vadd.f32 %v579_v36, %v309_v45  ;;  %v313_v61 = vmul.f32 %v565_v22, %v278_v50  ;;  %v373_v63 = vmax.f32 %v341_v48, 0.0  ;;  %v345_v0 = vadd.f32 %v579_v36, %v310_v49 }
  0x3f   : > { %396 = vst [vmem:[%s596_s10 + $0x58] sm:$0xff] %v364_v26  ;;  %v314_v1 = vmul.f32 %v565_v22, %v279_v54  ;;  %v374_v3 = vmax.f32 %v342_v52, 0.0  ;;  %v346_v4 = vadd.f32 %v579_v36, %v311_v53  ;;  %v315_v5 = vmul.f32 %v565_v22, %v280_v58 }
  0x40   : > { %397 = vst [vmem:[%s596_s10 + $0x60] sm:$0xff] %v365_v30  ;;  %v375_v6 = vmax.f32 %v343_v56, 0.0  ;;  %v347_v7 = vadd.f32 %v579_v36, %v312_v57  ;;  %v316_v8 = vmul.f32 %v565_v22, %v281_v62  ;;  %v376_v9 = vmax.f32 %v344_v60, 0.0 }
  0x41   : > { %398 = vst [vmem:[%s596_s10 + $0x68] sm:$0xff] %v366_v34  ;;  %v348_v10 = vadd.f32 %v579_v36, %v313_v61  ;;  %v317_v11 = vmul.f32 %v565_v22, %v282_v2  ;;  %v377_v12 = vmax.f32 %v345_v0, 0.0  ;;  %v349_v13 = vadd.f32 %v579_v36, %v314_v1 }
  0x42   : > { %399 = vst [vmem:[%s596_s10 + $0x70] sm:$0xff] %v367_v39  ;;  %v378_v14 = vmax.f32 %v346_v4, 0.0  ;;  %v350_v15 = vadd.f32 %v579_v36, %v315_v5  ;;  %v379_v16 = vmax.f32 %v347_v7, 0.0  ;;  %v351_v17 = vadd.f32 %v579_v36, %v316_v8 }
  0x43   : > { %400 = vst [vmem:[%s596_s10 + $0x78] sm:$0xff] %v368_v43  ;;  %v380_v22 = vmax.f32 %v348_v10, 0.0  ;;  %v352_v18 = vadd.f32 %v579_v36, %v317_v11  ;;  %v381_v19 = vmax.f32 %v349_v13, 0.0 }
  0x44   : > { %401 = vst [vmem:[%s596_s10 + $0x80] sm:$0xff] %v369_v47  ;;  %v382_v20 = vmax.f32 %v350_v15, 0.0  ;;  %v383_v21 = vmax.f32 %v351_v17, 0.0 }
  0x45   : > { %402 = vst [vmem:[%s596_s10 + $0x88] sm:$0xff] %v370_v51  ;;  %v384_v23 = vmax.f32 %v352_v18, 0.0 }
  0x46   : > { %403 = vst [vmem:[%s596_s10 + $0x90] sm:$0xff] %v371_v55 }
  0x47   : > { %404 = vst [vmem:[%s596_s10 + $0x98] sm:$0xff] %v372_v59 }
  0x48   : > { %405 = vst [vmem:[%s596_s10 + $0xa0] sm:$0xff] %v373_v63 }
  0x49   : > { %406 = vst [vmem:[%s596_s10 + $0xa8] sm:$0xff] %v374_v3 }
  0x4a   : > { %407 = vst [vmem:[%s596_s10 + $0xb0] sm:$0xff] %v375_v6 }
  0x4b   : > { %408 = vst [vmem:[%s596_s10 + $0xb8] sm:$0xff] %v376_v9 }
  0x4c   : > { %409 = vst [vmem:[%s596_s10 + $0xc0] sm:$0xff] %v377_v12 }
  0x4d   : > { %410 = vst [vmem:[%s596_s10 + $0xc8] sm:$0xff] %v378_v14 }
  0x4e   : > { %411 = vst [vmem:[%s596_s10 + $0xd0] sm:$0xff] %v379_v16 }
  0x4f   : > { %412 = vst [vmem:[%s596_s10 + $0xd8] sm:$0xff] %v380_v22 }
  0x50   : > { %413 = vst [vmem:[%s596_s10 + $0xe0] sm:$0xff] %v381_v19 }
  0x51   : > { %414 = vst [vmem:[%s596_s10 + $0xe8] sm:$0xff] %v382_v20 }
  0x52   : > { %415 = vst [vmem:[%s596_s10 + $0xf0] sm:$0xff] %v383_v21 }
  0x53   : > { %416 = vst [vmem:[%s596_s10 + $0xf8] sm:$0xff] %v384_v23 }
  0x54 PF: > { %s15_s18 = sadd.s32 1, %s500_s18  }
  0x55   : > { %p12_p4 = scmp.ge.s32.totalorder %s15_s18, 4  }
  0x57   :  { %14 = sbr.rel (!%p12_p4) target bundleno = 1 (0x1), region = 70 }

// kernel: resnet_block_forward.4
= control target key start
LH: loop header
LB: loop body
LE: loop exit
PB: predicated region body
PF: predicated region fallthrough
CT: control target
= control target key end

     0   :  { %s894_s15 = smov 0   ;;  %s1119_s0 = inlined_call_operand.vmem [shape: bf16[512,128], index: 0, kind: input, shape index: {}]   ;;  %s1120_s1 = inlined_call_operand.vmem [shape: bf16[128,128], index: 1, kind: input, shape index: {}]   ;;  %s1121_s2 = inlined_call_operand.vmem [shape: f32[512,128], index: 2, kind: output, shape index: {0}]   ;;  %s1122_s3 = inlined_call_operand.vmem [shape: f32[1,128], index: 3, kind: output, shape index: {1}]   ;;  %s1123_s4 = inlined_call_operand.vmem [shape: f32[1,128], index: 4, kind: output, shape index: {2}]  }
   0x1 LB: > { %s695_s16 = sadd.s32 4294967295, %s866_s15   ;;  %p699_p0 = scmp.ge.s32.totalorder %s866_s15, 1  ;;  %s866_s15 = sphi %s894_s15, %s15_s15  }
   0x2   : > { %p158_p1 = scmp.lt.s32.totalorder %s866_s15, 3 }
   0x4   : > { %p159_p2 = pnand %p699_p0, %p158_p1 }
   0x5   : > { %s700_s17 = sshll.u32 (!%p159_p2), %s695_s16, 5  ;;  %p704_p4 = scmp.ne.s32.totalorder (!%p159_p2), %s695_s16, 0 }
   0x6   : > { %162 = sbr.rel (%p159_p2) target bundleno = 300 (0x12c), region = 28  ;;  %p185_p3 = scmp.lt.s32.totalorder (!%p159_p2), %s700_s17, 63 }
   0xb   : > { %s1125_s17 = smov (!%p185_p3, %s700_s17), 63  ;;  %199 = sbr.rel (%p704_p4) target bundleno = 19 (0x13), region = 32 }
   0xc   : > { %s701_s18 = sshll.u32 %s1125_s17, 2  ;;  %s703_s19 = sshll.u32 %s1125_s17, 3 }
   0xd   : > { %s905_s22 = scalar_lea.vmem %s1119_s0, %s701_s18  ;;  %s910_s25 = scalar_lea.vmem %s1121_s2, %s703_s19 }
  0x10   : > { %v868_v0 = vmov 0.0  }
  0x11   : > { %200 = vst [vmem:[%s1122_s3] sm:$0x1] %v868_v0 }
  0x12   : > { %201 = vst [vmem:[%s1123_s4] sm:$0x1] %v868_v0 }
  0x13 PF: > { %v826_v1 = vld [vmem:[%s1120_s1 + $0x38] sm:$0xff]  ;;  %v825_v2 = vld [vmem:[%s1120_s1 + $0x30] sm:$0xff]  ;;  %v824_v3 = vld [vmem:[%s1120_s1 + $0x28] sm:$0xff] }
  0x14   : > { %394 = vmatpush.bf16.msra.mxu0 %v826_v1  ;;  %827 = vmatpush.bf16.msra.mxu1 %v826_v1  ;;  %v823_v4 = vld [vmem:[%s1120_s1 + $0x20] sm:$0xff]  ;;  %v822_v5 = vld [vmem:[%s1120_s1 + $0x18] sm:$0xff]  ;;  %v821_v6 = vld [vmem:[%s1120_s1 + $0x10] sm:$0xff] }
  0x15   : > { %828 = vmatpush.bf16.msra.mxu2 %v826_v1  ;;  %829 = vmatpush.bf16.msra.mxu3 %v826_v1  ;;  %v820_v7 = vld [vmem:[%s1120_s1 + $0x8] sm:$0xff]  ;;  %v819_v8 = vld [vmem:[%s1120_s1] sm:$0xff]  ;;  %v805_v17 = vld [vmem:[%s905_s22 + $0x10] sm:$0xff] }
  0x16   : > { %v803_v9 = vld [vmem:[%s905_s22] sm:$0xff]  ;;  %v804_v13 = vld [vmem:[%s905_s22 + $0x8] sm:$0xff]  ;;  %v809_v18 = vld [vmem:[%s905_s22 + $0x30] sm:$0xff] }
  0x17   : > { %v807_v10 = vld [vmem:[%s905_s22 + $0x20] sm:$0xff]  ;;  %v808_v14 = vld [vmem:[%s905_s22 + $0x28] sm:$0xff]  ;;  %v813_v19 = vld [vmem:[%s905_s22 + $0x50] sm:$0xff] }
  0x18   : > { %395 = vmatpush.bf16.msra.mxu0 %v825_v2  ;;  %830 = vmatpush.bf16.msra.mxu1 %v825_v2  ;;  %v811_v11 = vld [vmem:[%s905_s22 + $0x40] sm:$0xff]  ;;  %v812_v15 = vld [vmem:[%s905_s22 + $0x48] sm:$0xff]  ;;  %v817_v20 = vld [vmem:[%s905_s22 + $0x70] sm:$0xff] }
  0x19   : > { %831 = vmatpush.bf16.msra.mxu2 %v825_v2  ;;  %832 = vmatpush.bf16.msra.mxu3 %v825_v2  ;;  %v815_v12 = vld [vmem:[%s905_s22 + $0x60] sm:$0xff]  ;;  %v816_v16 = vld [vmem:[%s905_s22 + $0x68] sm:$0xff]  ;;  %v806_v21 = vld [vmem:[%s905_s22 + $0x18] sm:$0xff] }
  0x1a   : > { %v810_v22 = vld [vmem:[%s905_s22 + $0x38] sm:$0xff] }
  0x1b   : > { %v814_v23 = vld [vmem:[%s905_s22 + $0x58] sm:$0xff] }
  0x1c   : > { %396 = vmatpush.bf16.msra.mxu0 %v824_v3  ;;  %833 = vmatpush.bf16.msra.mxu1 %v824_v3  ;;  %v818_v24 = vld [vmem:[%s905_s22 + $0x78] sm:$0xff] }
  0x1d   : > { %834 = vmatpush.bf16.msra.mxu2 %v824_v3  ;;  %835 = vmatpush.bf16.msra.mxu3 %v824_v3 }
  0x20   : > { %397 = vmatpush.bf16.msra.mxu0 %v823_v4  ;;  %836 = vmatpush.bf16.msra.mxu1 %v823_v4 }
  0x21   : > { %837 = vmatpush.bf16.msra.mxu2 %v823_v4  ;;  %838 = vmatpush.bf16.msra.mxu3 %v823_v4 }
  0x24   : > { %398 = vmatpush.bf16.msra.mxu0 %v822_v5  ;;  %839 = vmatpush.bf16.msra.mxu1 %v822_v5 }
  0x25   : > { %840 = vmatpush.bf16.msra.mxu2 %v822_v5  ;;  %841 = vmatpush.bf16.msra.mxu3 %v822_v5 }
  0x28   : > { %399 = vmatpush.bf16.msra.mxu0 %v821_v6  ;;  %842 = vmatpush.bf16.msra.mxu1 %v821_v6 }
  0x29   : > { %843 = vmatpush.bf16.msra.mxu2 %v821_v6  ;;  %844 = vmatpush.bf16.msra.mxu3 %v821_v6 }
  0x2c   : > { %400 = vmatpush.bf16.msra.mxu0 %v820_v7  ;;  %845 = vmatpush.bf16.msra.mxu1 %v820_v7 }
  0x2d   : > { %846 = vmatpush.bf16.msra.mxu2 %v820_v7  ;;  %847 = vmatpush.bf16.msra.mxu3 %v820_v7 }
  0x30   : > { %401 = vmatpush.bf16.msra.mxu0 %v819_v8  ;;  %848 = vmatpush.bf16.msra.mxu1 %v819_v8 }
  0x31   : > { %849 = vmatpush.bf16.msra.mxu2 %v819_v8  ;;  %850 = vmatpush.bf16.msra.mxu3 %v819_v8 }
  0x33   : > { %402 = vmatmul.bf16.vlgmr.msra.gmra.mxu0 %v803_v9  ;;  %422 = vmatmul.bf16.vlgmr.msra.gmra.mxu1 %v807_v10 }
  0x34   : > { %442 = vmatmul.bf16.vlgmr.msra.gmra.mxu2 %v811_v11  ;;  %462 = vmatmul.bf16.vlgmr.msra.gmra.mxu3 %v815_v12 }
  0x43   : > { %407 = vmatmul.bf16.gmra.mxu0 %v804_v13  ;;  %427 = vmatmul.bf16.gmra.mxu1 %v808_v14 }
  0x44   : > { %447 = vmatmul.bf16.gmra.mxu2 %v812_v15  ;;  %467 = vmatmul.bf16.gmra.mxu3 %v816_v16 }
  0x53   : > { %412 = vmatmul.bf16.gmra.mxu0 %v805_v17  ;;  %432 = vmatmul.bf16.gmra.mxu1 %v809_v18 }
  0x54   : > { %452 = vmatmul.bf16.gmra.mxu2 %v813_v19  ;;  %472 = vmatmul.bf16.gmra.mxu3 %v817_v20 }
  0x63   : > { %417 = vmatmul.bf16.gmra.mxu0 %v806_v21  ;;  %437 = vmatmul.bf16.gmra.mxu1 %v810_v22 }
  0x64   : > { %457 = vmatmul.bf16.gmra.mxu2 %v814_v23  ;;  %477 = vmatmul.bf16.gmra.mxu3 %v818_v24 }
  0xb0   : > { %v403_v25 = vpop.f32.mrf.mxu0  ;;  %v958_v26 = vpop.f32.mrf.mxu1 }
  0xb1   : > { %483 = vst [vmem:[%s910_s25] sm:$0xff] %v403_v25  ;;  %v556_v48 = vmul.f32 %v403_v25, %v403_v25  ;;  %v564_v12 = vmul.f32 %v958_v26, %v958_v26 }
  0xb2   : > { %491 = vst [vmem:[%s910_s25 + $0x40] sm:$0xff] %v958_v26 }
  0xb7   : > { %v963_v27 = vpop.f32.mrf.mxu2  ;;  %v970_v30 = vpop.f32.mrf.mxu3 }
  0xb8   : > { %v405_v28 = vpop.f32.mrf.mxu0  ;;  %v965_v29 = vpop.f32.mrf.mxu1  ;;  %499 = vst [vmem:[%s910_s25 + $0x80] sm:$0xff] %v963_v27 }
  0xb9   : > { %484 = vst [vmem:[%s910_s25 + $0x8] sm:$0xff] %v405_v28  ;;  %v557_v47 = vmul.f32 %v405_v28, %v405_v28  ;;  %v516_v49 = vadd.f32 %v405_v28, %v403_v25  ;;  %v565_v15 = vmul.f32 %v965_v29, %v965_v29 }
  0xba   : > { %492 = vst [vmem:[%s910_s25 + $0x48] sm:$0xff] %v965_v29 }
  0xbb   : > { %507 = vst [vmem:[%s910_s25 + $0xc0] sm:$0xff] %v970_v30  ;;  %v588_v51 = vadd.f32 %v557_v47, %v556_v48 }
  0xbf   : > { %v976_v31 = vpop.f32.mrf.mxu2  ;;  %v983_v34 = vpop.f32.mrf.mxu3 }
  0xc0   : > { %v408_v32 = vpop.f32.mrf.mxu0  ;;  %v978_v33 = vpop.f32.mrf.mxu1  ;;  %500 = vst [vmem:[%s910_s25 + $0x88] sm:$0xff] %v976_v31 }
  0xc1   : > { %485 = vst [vmem:[%s910_s25 + $0x10] sm:$0xff] %v408_v32  ;;  %v558_v50 = vmul.f32 %v408_v32, %v408_v32  ;;  %v517_v52 = vadd.f32 %v516_v49, %v408_v32  ;;  %v566_v18 = vmul.f32 %v978_v33, %v978_v33 }
  0xc2   : > { %493 = vst [vmem:[%s910_s25 + $0x50] sm:$0xff] %v978_v33 }
  0xc3   : > { %508 = vst [vmem:[%s910_s25 + $0xc8] sm:$0xff] %v983_v34  ;;  %v589_v57 = vadd.f32 %v588_v51, %v558_v50  ;;  %v572_v50 = vmul.f32 %v963_v27, %v963_v27 }
  0xc7   : > { %v989_v35 = vpop.f32.mrf.mxu2  ;;  %v996_v38 = vpop.f32.mrf.mxu3 }
  0xc8   : > { %v410_v36 = vpop.f32.mrf.mxu0  ;;  %v991_v37 = vpop.f32.mrf.mxu1  ;;  %501 = vst [vmem:[%s910_s25 + $0x90] sm:$0xff] %v989_v35 }
  0xc9   : > { %486 = vst [vmem:[%s910_s25 + $0x18] sm:$0xff] %v410_v36  ;;  %v559_v53 = vmul.f32 %v410_v36, %v410_v36  ;;  %v518_v58 = vadd.f32 %v517_v52, %v410_v36  ;;  %v567_v22 = vmul.f32 %v991_v37, %v991_v37 }
  0xca   : > { %494 = vst [vmem:[%s910_s25 + $0x58] sm:$0xff] %v991_v37 }
  0xcb   : > { %509 = vst [vmem:[%s910_s25 + $0xd0] sm:$0xff] %v996_v38  ;;  %v590_v61 = vadd.f32 %v589_v57, %v559_v53 }
  0xcf   : > { %v1002_v39 = vpop.f32.mrf.mxu2  ;;  %v1009_v42 = vpop.f32.mrf.mxu3 }
  0xd0   : > { %v413_v40 = vpop.f32.mrf.mxu0  ;;  %v1004_v41 = vpop.f32.mrf.mxu1  ;;  %502 = vst [vmem:[%s910_s25 + $0x98] sm:$0xff] %v1002_v39 }
  0xd1   : > { %487 = vst [vmem:[%s910_s25 + $0x20] sm:$0xff] %v413_v40  ;;  %v560_v59 = vmul.f32 %v413_v40, %v413_v40  ;;  %v519_v62 = vadd.f32 %v518_v58, %v413_v40  ;;  %v575_v58 = vmul.f32 %v1002_v39, %v1002_v39 }
  0xd2   : > { %495 = vst [vmem:[%s910_s25 + $0x60] sm:$0xff] %v1004_v41 }
  0xd3   : > { %510 = vst [vmem:[%s910_s25 + $0xd8] sm:$0xff] %v1009_v42  ;;  %v591_v0 = vadd.f32 %v590_v61, %v560_v59 }
  0xd7   : > { %v1015_v43 = vpop.f32.mrf.mxu2  ;;  %v1022_v46 = vpop.f32.mrf.mxu3 }
  0xd8   : > { %v415_v44 = vpop.f32.mrf.mxu0  ;;  %v1017_v45 = vpop.f32.mrf.mxu1  ;;  %503 = vst [vmem:[%s910_s25 + $0xa0] sm:$0xff] %v1015_v43 }
  0xd9   : > { %488 = vst [vmem:[%s910_s25 + $0x28] sm:$0xff] %v415_v44  ;;  %v561_v63 = vmul.f32 %v415_v44, %v415_v44  ;;  %v520_v1 = vadd.f32 %v519_v62, %v415_v44  ;;  %v569_v32 = vmul.f32 %v1017_v45, %v1017_v45 }
  0xda   : > { %496 = vst [vmem:[%s910_s25 + $0x68] sm:$0xff] %v1017_v45 }
  0xdb   : > { %511 = vst [vmem:[%s910_s25 + $0xe0] sm:$0xff] %v1022_v46  ;;  %v592_v3 = vadd.f32 %v591_v0, %v561_v63 }
  0xdf   : > { %v1028_v54 = vpop.f32.mrf.mxu2  ;;  %v1033_v60 = vpop.f32.mrf.mxu3 }
  0xe0   : > { %v418_v55 = vpop.f32.mrf.mxu0  ;;  %v438_v56 = vpop.f32.mrf.mxu1  ;;  %504 = vst [vmem:[%s910_s25 + $0xa8] sm:$0xff] %v1028_v54  ;;  %v577_v0 = vmul.f32 %v1028_v54, %v1028_v54 }
  0xe1   : > { %489 = vst [vmem:[%s910_s25 + $0x30] sm:$0xff] %v418_v55  ;;  %v562_v2 = vmul.f32 %v418_v55, %v418_v55  ;;  %v521_v4 = vadd.f32 %v520_v1, %v418_v55  ;;  %v570_v44 = vmul.f32 %v438_v56, %v438_v56 }
  0xe2   : > { %497 = vst [vmem:[%s910_s25 + $0x70] sm:$0xff] %v438_v56 }
  0xe3   : > { %512 = vst [vmem:[%s910_s25 + $0xe8] sm:$0xff] %v1033_v60  ;;  %v593_v8 = vadd.f32 %v592_v3, %v562_v2 }
  0xe7   : > { %v458_v5 = vpop.f32.mrf.mxu2  ;;  %v1040_v11 = vpop.f32.mrf.mxu3 }
  0xe8   : > { %v420_v6 = vpop.f32.mrf.mxu0  ;;  %v440_v7 = vpop.f32.mrf.mxu1  ;;  %505 = vst [vmem:[%s910_s25 + $0xb0] sm:$0xff] %v458_v5  ;;  %v578_v3 = vmul.f32 %v458_v5, %v458_v5 }
  0xe9   : > { %490 = vst [vmem:[%s910_s25 + $0x38] sm:$0xff] %v420_v6  ;;  %v522_v9 = vadd.f32 %v521_v4, %v420_v6  ;;  %v563_v10 = vmul.f32 %v420_v6, %v420_v6 }
  0xea   : > { %498 = vst [vmem:[%s910_s25 + $0x78] sm:$0xff] %v440_v7 }
  0xeb   : > { %v523_v13 = vadd.f32 %v522_v9, %v958_v26  ;;  %v594_v14 = vadd.f32 %v593_v8, %v563_v10  ;;  %513 = vst [vmem:[%s910_s25 + $0xf0] sm:$0xff] %v1040_v11  ;;  %v568_v26 = vmul.f32 %v1004_v41, %v1004_v41 }
  0xed   : > { %v524_v16 = vadd.f32 %v523_v13, %v965_v29  ;;  %v595_v17 = vadd.f32 %v594_v14, %v564_v12  ;;  %v583_v14 = vmul.f32 %v1009_v42, %v1009_v42 }
  0xef   : > { %v525_v19 = vadd.f32 %v524_v16, %v978_v33  ;;  %v596_v20 = vadd.f32 %v595_v17, %v565_v15  ;;  %v460_v21 = vpop.f32.mrf.mxu2  ;;  %v480_v25 = vpop.f32.mrf.mxu3 }
  0xf0   : > { %506 = vst [vmem:[%s910_s25 + $0xb8] sm:$0xff] %v460_v21 }
  0xf1   : > { %v597_v23 = vadd.f32 %v596_v20, %v566_v18  ;;  %v526_v24 = vadd.f32 %v525_v19, %v991_v37  ;;  %514 = vst [vmem:[%s910_s25 + $0xf8] sm:$0xff] %v480_v25  ;;  %v571_v37 = vmul.f32 %v440_v7, %v440_v7  ;;  %v585_v19 = vmul.f32 %v1033_v60, %v1033_v60 }
  0xf3   : > { %v527_v28 = vadd.f32 %v526_v24, %v1004_v41  ;;  %v598_v29 = vadd.f32 %v597_v23, %v567_v22  ;;  %v573_v41 = vmul.f32 %v976_v31, %v976_v31  ;;  %v586_v22 = vmul.f32 %v1040_v11, %v1040_v11 }
  0xf4   : > { %v587_v24 = vmul.f32 %v480_v25, %v480_v25 }
  0xf5   : > { %v528_v33 = vadd.f32 %v527_v28, %v1017_v45  ;;  %v599_v36 = vadd.f32 %v598_v29, %v568_v26  ;;  %v574_v45 = vmul.f32 %v989_v35, %v989_v35 }
  0xf7   : > { %v529_v40 = vadd.f32 %v528_v33, %v438_v56  ;;  %v600_v47 = vadd.f32 %v599_v36, %v569_v32 }
  0xf9   : > { %v601_v48 = vadd.f32 %v600_v47, %v570_v44  ;;  %v530_v49 = vadd.f32 %v529_v40, %v440_v7  ;;  %v579_v7 = vmul.f32 %v460_v21, %v460_v21  ;;  %v515_v47 = vld [vmem:[%s1122_s3] sm:$0x1] }
  0xfb   : > { %v531_v51 = vadd.f32 %v530_v49, %v963_v27  ;;  %v602_v52 = vadd.f32 %v601_v48, %v571_v37  ;;  %v576_v27 = vmul.f32 %v1015_v43, %v1015_v43 }
  0xfd   : > { %v532_v53 = vadd.f32 %v531_v51, %v976_v31  ;;  %v603_v55 = vadd.f32 %v602_v52, %v572_v50 }
  0xff   : > { %v533_v56 = vadd.f32 %v532_v53, %v989_v35  ;;  %v604_v57 = vadd.f32 %v603_v55, %v573_v41 }
 0x101   : > { %v605_v59 = vadd.f32 %v604_v57, %v574_v45  ;;  %v534_v61 = vadd.f32 %v533_v56, %v1002_v39  ;;  %v580_v39 = vmul.f32 %v970_v30, %v970_v30 }
 0x103   : > { %v535_v62 = vadd.f32 %v534_v61, %v1015_v43  ;;  %v606_v63 = vadd.f32 %v605_v59, %v575_v58  ;;  %v581_v43 = vmul.f32 %v983_v34, %v983_v34 }
 0x105   : > { %v536_v31 = vadd.f32 %v535_v62, %v1028_v54  ;;  %v607_v1 = vadd.f32 %v606_v63, %v576_v27  ;;  %v582_v54 = vmul.f32 %v996_v38, %v996_v38 }
 0x107   : > { %v608_v35 = vadd.f32 %v607_v1, %v577_v0  ;;  %v537_v2 = vadd.f32 %v536_v31, %v458_v5 }
 0x109   : > { %v609_v4 = vadd.f32 %v608_v35, %v578_v3  ;;  %v538_v6 = vadd.f32 %v537_v2, %v460_v21 }
 0x10b   : > { %v539_v8 = vadd.f32 %v538_v6, %v970_v30  ;;  %v610_v9 = vadd.f32 %v609_v4, %v579_v7  ;;  %v584_v30 = vmul.f32 %v1022_v46, %v1022_v46 }
 0x10d   : > { %v540_v10 = vadd.f32 %v539_v8, %v983_v34  ;;  %v611_v12 = vadd.f32 %v610_v9, %v580_v39 }
 0x10f   : > { %v541_v5 = vadd.f32 %v540_v10, %v996_v38  ;;  %v612_v13 = vadd.f32 %v611_v12, %v581_v43 }
 0x111   : > { %v613_v15 = vadd.f32 %v612_v13, %v582_v54  ;;  %v542_v16 = vadd.f32 %v541_v5, %v1009_v42 }
 0x113   : > { %v543_v17 = vadd.f32 %v542_v16, %v1022_v46  ;;  %v614_v18 = vadd.f32 %v613_v15, %v583_v14 }
 0x115   : > { %v544_v34 = vadd.f32 %v543_v17, %v1033_v60  ;;  %v615_v20 = vadd.f32 %v614_v18, %v584_v30 }
 0x117   : > { %v616_v38 = vadd.f32 %v615_v20, %v585_v19  ;;  %v545_v21 = vadd.f32 %v544_v34, %v1040_v11  ;;  %v555_v11 = vld [vmem:[%s1123_s4] sm:$0x1] }
 0x119   : > { %v617_v23 = vadd.f32 %v616_v38, %v586_v22  ;;  %v546_v42 = vadd.f32 %v545_v21, %v480_v25 }
 0x11b   : > { %v547_v26 = vrot.slane %v546_v42, 4  ;;  %v618_v28 = vadd.f32 %v617_v23, %v587_v24 }
 0x11d   : > { %v548_v29 = vadd.f32 %v547_v26, %v546_v42  ;;  %v619_v46 = vrot.slane %v618_v28, 4 }
 0x11f   : > { %v549_v32 = vrot.slane %v548_v29, 2  ;;  %v620_v33 = vadd.f32 %v619_v46, %v618_v28 }
 0x121   : > { %v550_v36 = vadd.f32 %v549_v32, %v548_v29  ;;  %v621_v40 = vrot.slane %v620_v33, 2 }
 0x123   : > { %v551_v44 = vrot.slane %v550_v36, 1  ;;  %v622_v60 = vadd.f32 %v621_v40, %v620_v33 }
 0x125   : > { %v552_v48 = vadd.f32 %v551_v44, %v550_v36  ;;  %v623_v49 = vrot.slane %v622_v60, 1 }
 0x127   : > { %v553_v25 = vadd.f32 %v552_v48, %v515_v47  ;;  %v624_v37 = vadd.f32 %v623_v49, %v622_v60 }
 0x129   : > { %554 = vst [vmem:[%s1122_s3] sm:$0x1] %v553_v25  ;;  %v625_v50 = vadd.f32 %v624_v37, %v555_v11 }
 0x12b   : > { %626 = vst [vmem:[%s1123_s4] sm:$0x1] %v625_v50 }
 0x12c PF: > { %s15_s15 = sadd.s32 1, %s866_s15  }
 0x12d   : > { %p12_p5 = scmp.ge.s32.totalorder %s15_s15, 4  }
 0x12f   :  { %14 = sbr.rel (!%p12_p5) target bundleno = 1 (0x1), region = 78 }

// kernel: resnet_block_forward.7
= control target key start
LH: loop header
LB: loop body
LE: loop exit
PB: predicated region body
PF: predicated region fallthrough
CT: control target
= control target key end

     0   :  { %s696_s21 = smov 0   ;;  %s903_s0 = inlined_call_operand.vmem [shape: f32[512,128], index: 0, kind: input, shape index: {}]   ;;  %s904_s1 = inlined_call_operand.vmem [shape: f32[1,128], index: 1, kind: input, shape index: {}]   ;;  %s905_s2 = inlined_call_operand.vmem [shape: f32[1,128], index: 2, kind: input, shape index: {}]   ;;  %s906_s3 = inlined_call_operand.vmem [shape: f32[1,128], index: 3, kind: input, shape index: {}]   ;;  %s907_s4 = inlined_call_operand.vmem [shape: f32[1,128], index: 4, kind: input, shape index: {}]   ;;  %s908_s5 = inlined_call_operand.vmem [shape: f32[512,128], index: 5, kind: input, shape index: {}]   ;;  %s909_s6 = inlined_call_operand.vmem [shape: f32[512,128], index: 6, kind: output, shape index: {}]  }
   0x1 LB: > { %s630_s22 = sadd.s32 4294967295, %s659_s21   ;;  %p634_p0 = scmp.ge.s32.totalorder %s659_s21, 1  ;;  %s659_s21 = sphi %s696_s21, %s16_s21  }
   0x2   : > { %p224_p1 = scmp.lt.s32.totalorder %s659_s21, 3 }
   0x4   : > { %p225_p2 = pnand %p634_p0, %p224_p1 }
   0x5   : > { %s635_s27 = sshll.u32 (!%p225_p2), %s630_s22, 5 }
   0x6   : > { %228 = sbr.rel (%p225_p2) target bundleno = 92 (0x5c), region = 44  ;;  %p260_p3 = scmp.lt.s32.totalorder (!%p225_p2), %s635_s27, 63 }
   0xb   : > { %v277_v0 = vld [vmem:[%s904_s1] sm:$0x1]  ;;  %s911_s27 = smov (!%p260_p3, %s635_s27), 63 }
   0xc   : > { %v279_v1 = vld [vmem:[%s905_s2] sm:$0x1]  ;;  %v278_v2 = vmul.f32 0.001953125, %v277_v0  ;;  %s710_s28 = sshll.u32 %s911_s27, 3 }
   0xd   : > { %v280_v3 = vmul.f32 0.001953125, %v279_v1  ;;  %s716_s7 = scalar_lea.vmem %s903_s0, %s710_s28  ;;  %v284_v13 = vld [vmem:[%s906_s3] sm:$0x1]  ;;  %s747_s14 = scalar_lea.vmem %s908_s5, %s710_s28 }
   0xe   : > { %v281_v4 = vmul.f32 %v278_v2, %v278_v2  ;;  %v297_v17 = vld [vmem:[%s907_s4] sm:$0x1]  ;;  %v301_v19 = vld [vmem:[%s716_s7 + $0x8] sm:$0xff]  ;;  %v302_v20 = vld [vmem:[%s716_s7 + $0x10] sm:$0xff]  ;;  %s782_s17 = scalar_lea.vmem %s909_s6, %s710_s28 }
   0xf   : > { %v300_v18 = vld [vmem:[%s716_s7] sm:$0xff]  ;;  %v303_v21 = vld [vmem:[%s716_s7 + $0x18] sm:$0xff]  ;;  %v305_v25 = vld [vmem:[%s716_s7 + $0x28] sm:$0xff] }
  0x10   : > { %v282_v5 = vsub.f32 %v280_v3, %v281_v4  ;;  %v304_v22 = vld [vmem:[%s716_s7 + $0x20] sm:$0xff]  ;;  %v306_v26 = vld [vmem:[%s716_s7 + $0x30] sm:$0xff]  ;;  %v307_v27 = vld [vmem:[%s716_s7 + $0x38] sm:$0xff] }
  0x11   : > { %v308_v28 = vld [vmem:[%s716_s7 + $0x40] sm:$0xff]  ;;  %v309_v29 = vld [vmem:[%s716_s7 + $0x48] sm:$0xff]  ;;  %v310_v30 = vld [vmem:[%s716_s7 + $0x50] sm:$0xff] }
  0x12   : > { %v283_v6 = vmax.f32 %v282_v5, 0.0  ;;  %v311_v35 = vld [vmem:[%s716_s7 + $0x58] sm:$0xff]  ;;  %v312_v36 = vld [vmem:[%s716_s7 + $0x60] sm:$0xff]  ;;  %v313_v37 = vld [vmem:[%s716_s7 + $0x68] sm:$0xff] }
  0x13   : > { %v434_v51 = vld [vmem:[%s747_s14] sm:$0xff]  ;;  %v435_v53 = vld [vmem:[%s747_s14 + $0x8] sm:$0xff]  ;;  %v436_v55 = vld [vmem:[%s747_s14 + $0x10] sm:$0xff] }
  0x14   : > { %v285_v7 = vadd.f32 1e-05, %v283_v6  ;;  %v437_v57 = vld [vmem:[%s747_s14 + $0x18] sm:$0xff]  ;;  %v438_v59 = vld [vmem:[%s747_s14 + $0x20] sm:$0xff]  ;;  %v439_v61 = vld [vmem:[%s747_s14 + $0x28] sm:$0xff] }
  0x15   : > { %v440_v4 = vld [vmem:[%s747_s14 + $0x30] sm:$0xff]  ;;  %v441_v5 = vld [vmem:[%s747_s14 + $0x38] sm:$0xff] }
  0x16   : > { %651 = vrsqrt.f32 %v285_v7  ;;  %vm292_vm0 = vweird.f32 %v285_v7 }
  0x1c   : > { %v652_v8 = vpop.eup %651 }
  0x1d   : > { %v287_v9 = vmul.f32 %v652_v8, %v285_v7  ;;  %vm293_vm1 = vweird.f32 %v652_v8 }
  0x1e   : > { %vm294_vm2 = vmor %vm292_vm0, %vm293_vm1 }
  0x1f   : > { %v288_v10 = vmul.f32 %v652_v8, %v287_v9 }
  0x21   : > { %v289_v11 = vmul.f32 0.5, %v288_v10 }
  0x23   : > { %v290_v12 = vsub.f32 1.5, %v289_v11 }
  0x25   : > { %v291_v14 = vmul.f32 %v652_v8, %v290_v12 }
  0x27   : > { %v295_v15 = vsel %vm294_vm2, %v652_v8, %v291_v14 }
  0x28   : > { %v296_v16 = vmul.f32 %v295_v15, %v284_v13 }
  0x2a   : > { %v298_v23 = vmul.f32 %v296_v16, %v278_v2  ;;  %v729_v24 = vperm.slane %v296_v16, 0 }
  0x2c   : > { %v299_v31 = vsub.f32 %v297_v17, %v298_v23  ;;  %v335_v32 = vmul.f32 %v729_v24, %v300_v18  ;;  %v336_v33 = vmul.f32 %v729_v24, %v301_v19  ;;  %v337_v34 = vmul.f32 %v729_v24, %v302_v20  ;;  %v315_v23 = vld [vmem:[%s716_s7 + $0x78] sm:$0xff] }
  0x2d   : > { %v338_v38 = vmul.f32 %v729_v24, %v303_v21  ;;  %v339_v39 = vmul.f32 %v729_v24, %v304_v22  ;;  %v340_v40 = vmul.f32 %v729_v24, %v305_v25  ;;  %v341_v41 = vmul.f32 %v729_v24, %v306_v26  ;;  %v314_v22 = vld [vmem:[%s716_s7 + $0x70] sm:$0xff] }
  0x2e   : > { %v753_v42 = vperm.slane %v299_v31, 0  ;;  %v342_v43 = vmul.f32 %v729_v24, %v307_v27  ;;  %v343_v44 = vmul.f32 %v729_v24, %v308_v28  ;;  %v344_v45 = vmul.f32 %v729_v24, %v309_v29 }
  0x2f   : > { %v345_v46 = vmul.f32 %v729_v24, %v310_v30  ;;  %v346_v47 = vmul.f32 %v729_v24, %v311_v35  ;;  %v347_v48 = vmul.f32 %v729_v24, %v312_v36  ;;  %v348_v49 = vmul.f32 %v729_v24, %v313_v37  ;;  %v442_v30 = vld [vmem:[%s747_s14 + $0x40] sm:$0xff]  ;;  %v444_v35 = vld [vmem:[%s747_s14 + $0x50] sm:$0xff]  ;;  %v445_v36 = vld [vmem:[%s747_s14 + $0x58] sm:$0xff] }
  0x30   : > { %v370_v50 = vadd.f32 %v753_v42, %v335_v32  ;;  %v371_v52 = vadd.f32 %v753_v42, %v336_v33  ;;  %v372_v54 = vadd.f32 %v753_v42, %v337_v34  ;;  %v373_v56 = vadd.f32 %v753_v42, %v338_v38  ;;  %v443_v32 = vld [vmem:[%s747_s14 + $0x48] sm:$0xff]  ;;  %v446_v38 = vld [vmem:[%s747_s14 + $0x60] sm:$0xff] }
  0x31   : > { %v374_v58 = vadd.f32 %v753_v42, %v339_v39  ;;  %v375_v60 = vadd.f32 %v753_v42, %v340_v40  ;;  %v376_v62 = vadd.f32 %v753_v42, %v341_v41  ;;  %v377_v63 = vadd.f32 %v753_v42, %v342_v43 }
  0x32   : > { %v402_v0 = vmax.f32 %v370_v50, 0.0  ;;  %v403_v1 = vmax.f32 %v371_v52, 0.0  ;;  %v404_v2 = vmax.f32 %v372_v54, 0.0  ;;  %v405_v3 = vmax.f32 %v373_v56, 0.0  ;;  %v316_v52 = vld [vmem:[%s716_s7 + $0x80] sm:$0xff] }
  0x33   : > { %v406_v6 = vmax.f32 %v374_v58, 0.0  ;;  %v407_v7 = vmax.f32 %v375_v60, 0.0  ;;  %v408_v8 = vmax.f32 %v376_v62, 0.0  ;;  %v409_v9 = vmax.f32 %v377_v63, 0.0  ;;  %v449_v58 = vld [vmem:[%s747_s14 + $0x78] sm:$0xff] }
  0x34   : > { %v466_v10 = vadd.f32 %v434_v51, %v402_v0  ;;  %v467_v11 = vadd.f32 %v435_v53, %v403_v1  ;;  %v468_v12 = vadd.f32 %v436_v55, %v404_v2  ;;  %v469_v13 = vadd.f32 %v437_v57, %v405_v3  ;;  %v448_v57 = vld [vmem:[%s747_s14 + $0x70] sm:$0xff]  ;;  %v319_v1 = vld [vmem:[%s716_s7 + $0x98] sm:$0xff]  ;;  %v320_v2 = vld [vmem:[%s716_s7 + $0xa0] sm:$0xff] }
  0x35   : > { %v470_v14 = vadd.f32 %v438_v59, %v406_v6  ;;  %v471_v15 = vadd.f32 %v439_v61, %v407_v7  ;;  %v472_v16 = vadd.f32 %v440_v4, %v408_v8  ;;  %v473_v17 = vadd.f32 %v441_v5, %v409_v9  ;;  %v317_v59 = vld [vmem:[%s716_s7 + $0x88] sm:$0xff]  ;;  %v318_v0 = vld [vmem:[%s716_s7 + $0x90] sm:$0xff] }
  0x36   : > { %v498_v18 = vmax.f32 %v466_v10, 0.0  ;;  %v499_v19 = vmax.f32 %v467_v11, 0.0  ;;  %v500_v20 = vmax.f32 %v468_v12, 0.0  ;;  %v501_v21 = vmax.f32 %v469_v13, 0.0  ;;  %v321_v7 = vld [vmem:[%s716_s7 + $0xa8] sm:$0xff] }
  0x37   : > { %v502_v25 = vmax.f32 %v470_v14, 0.0  ;;  %v503_v26 = vmax.f32 %v471_v15, 0.0  ;;  %v504_v27 = vmax.f32 %v472_v16, 0.0  ;;  %v505_v28 = vmax.f32 %v473_v17, 0.0  ;;  %v322_v16 = vld [vmem:[%s716_s7 + $0xb0] sm:$0xff]  ;;  %v323_v17 = vld [vmem:[%s716_s7 + $0xb8] sm:$0xff] }
  0x38   : > { %530 = vst [vmem:[%s782_s17] sm:$0xff] %v498_v18  ;;  %v378_v29 = vadd.f32 %v753_v42, %v343_v44  ;;  %v379_v31 = vadd.f32 %v753_v42, %v344_v45  ;;  %v380_v33 = vadd.f32 %v753_v42, %v345_v46  ;;  %v381_v34 = vadd.f32 %v753_v42, %v346_v47  ;;  %v447_v47 = vld [vmem:[%s747_s14 + $0x68] sm:$0xff] }
  0x39   : > { %531 = vst [vmem:[%s782_s17 + $0x8] sm:$0xff] %v499_v19  ;;  %v382_v37 = vadd.f32 %v753_v42, %v347_v48  ;;  %v383_v39 = vadd.f32 %v753_v42, %v348_v49  ;;  %v349_v40 = vmul.f32 %v729_v24, %v314_v22  ;;  %v350_v41 = vmul.f32 %v729_v24, %v315_v23  ;;  %v450_v23 = vld [vmem:[%s747_s14 + $0x80] sm:$0xff] }
  0x3a   : > { %532 = vst [vmem:[%s782_s17 + $0x10] sm:$0xff] %v500_v20  ;;  %v410_v43 = vmax.f32 %v378_v29, 0.0  ;;  %v411_v44 = vmax.f32 %v379_v31, 0.0  ;;  %v412_v45 = vmax.f32 %v380_v33, 0.0  ;;  %v413_v46 = vmax.f32 %v381_v34, 0.0  ;;  %v452_v29 = vld [vmem:[%s747_s14 + $0x90] sm:$0xff] }
  0x3b   : > { %533 = vst [vmem:[%s782_s17 + $0x18] sm:$0xff] %v501_v21  ;;  %v414_v48 = vmax.f32 %v382_v37, 0.0  ;;  %v415_v50 = vmax.f32 %v383_v39, 0.0  ;;  %v384_v51 = vadd.f32 %v753_v42, %v349_v40  ;;  %v385_v49 = vadd.f32 %v753_v42, %v350_v41  ;;  %v455_v40 = vld [vmem:[%s747_s14 + $0xa8] sm:$0xff] }
  0x3c   : > { %534 = vst [vmem:[%s782_s17 + $0x20] sm:$0xff] %v502_v25  ;;  %v474_v53 = vadd.f32 %v442_v30, %v410_v43  ;;  %v475_v54 = vadd.f32 %v443_v32, %v411_v44  ;;  %v476_v55 = vadd.f32 %v444_v35, %v412_v45  ;;  %v477_v56 = vadd.f32 %v445_v36, %v413_v46  ;;  %v453_v30 = vld [vmem:[%s747_s14 + $0x98] sm:$0xff]  ;;  %v454_v32 = vld [vmem:[%s747_s14 + $0xa0] sm:$0xff] }
  0x3d   : > { %535 = vst [vmem:[%s782_s17 + $0x28] sm:$0xff] %v503_v26  ;;  %v478_v60 = vadd.f32 %v446_v38, %v414_v48  ;;  %v479_v61 = vadd.f32 %v447_v47, %v415_v50  ;;  %v416_v62 = vmax.f32 %v384_v51, 0.0  ;;  %v417_v63 = vmax.f32 %v385_v49, 0.0  ;;  %v451_v26 = vld [vmem:[%s747_s14 + $0x88] sm:$0xff]  ;;  %v456_v51 = vld [vmem:[%s747_s14 + $0xb0] sm:$0xff]  ;;  %v457_v49 = vld [vmem:[%s747_s14 + $0xb8] sm:$0xff] }
  0x3e   : > { %536 = vst [vmem:[%s782_s17 + $0x30] sm:$0xff] %v504_v27  ;;  %v506_v3 = vmax.f32 %v474_v53, 0.0  ;;  %v507_v4 = vmax.f32 %v475_v54, 0.0  ;;  %v508_v5 = vmax.f32 %v476_v55, 0.0  ;;  %v509_v6 = vmax.f32 %v477_v56, 0.0 }
  0x3f   : > { %537 = vst [vmem:[%s782_s17 + $0x38] sm:$0xff] %v505_v28  ;;  %v510_v8 = vmax.f32 %v478_v60, 0.0  ;;  %v511_v9 = vmax.f32 %v479_v61, 0.0  ;;  %v480_v10 = vadd.f32 %v448_v57, %v416_v62  ;;  %v481_v11 = vadd.f32 %v449_v58, %v417_v63  ;;  %v325_v57 = vld [vmem:[%s716_s7 + $0xc8] sm:$0xff]  ;;  %v326_v58 = vld [vmem:[%s716_s7 + $0xd0] sm:$0xff] }
  0x40   : > { %538 = vst [vmem:[%s782_s17 + $0x40] sm:$0xff] %v506_v3  ;;  %v351_v12 = vmul.f32 %v729_v24, %v316_v52  ;;  %v352_v13 = vmul.f32 %v729_v24, %v317_v59  ;;  %v353_v14 = vmul.f32 %v729_v24, %v318_v0  ;;  %v354_v15 = vmul.f32 %v729_v24, %v319_v1  ;;  %v324_v52 = vld [vmem:[%s716_s7 + $0xc0] sm:$0xff]  ;;  %v327_v59 = vld [vmem:[%s716_s7 + $0xd8] sm:$0xff]  ;;  %v329_v1 = vld [vmem:[%s716_s7 + $0xe8] sm:$0xff] }
  0x41   : > { %539 = vst [vmem:[%s782_s17 + $0x48] sm:$0xff] %v507_v4  ;;  %v512_v18 = vmax.f32 %v480_v10, 0.0  ;;  %v513_v19 = vmax.f32 %v481_v11, 0.0  ;;  %v355_v20 = vmul.f32 %v729_v24, %v320_v2  ;;  %v356_v21 = vmul.f32 %v729_v24, %v321_v7  ;;  %v328_v0 = vld [vmem:[%s716_s7 + $0xe0] sm:$0xff]  ;;  %v330_v10 = vld [vmem:[%s716_s7 + $0xf0] sm:$0xff]  ;;  %v331_v11 = vld [vmem:[%s716_s7 + $0xf8] sm:$0xff] }
  0x42   : > { %540 = vst [vmem:[%s782_s17 + $0x50] sm:$0xff] %v508_v5  ;;  %v386_v22 = vadd.f32 %v753_v42, %v351_v12  ;;  %v387_v25 = vadd.f32 %v753_v42, %v352_v13  ;;  %v388_v27 = vadd.f32 %v753_v42, %v353_v14  ;;  %v389_v28 = vadd.f32 %v753_v42, %v354_v15 }
  0x43   : > { %541 = vst [vmem:[%s782_s17 + $0x58] sm:$0xff] %v509_v6  ;;  %v390_v31 = vadd.f32 %v753_v42, %v355_v20  ;;  %v391_v33 = vadd.f32 %v753_v42, %v356_v21  ;;  %v357_v34 = vmul.f32 %v729_v24, %v322_v16  ;;  %v358_v35 = vmul.f32 %v729_v24, %v323_v17  ;;  %v458_v17 = vld [vmem:[%s747_s14 + $0xc0] sm:$0xff] }
  0x44   : > { %542 = vst [vmem:[%s782_s17 + $0x60] sm:$0xff] %v510_v8  ;;  %v418_v36 = vmax.f32 %v386_v22, 0.0  ;;  %v419_v37 = vmax.f32 %v387_v25, 0.0  ;;  %v420_v38 = vmax.f32 %v388_v27, 0.0  ;;  %v421_v39 = vmax.f32 %v389_v28, 0.0  ;;  %v460_v22 = vld [vmem:[%s747_s14 + $0xd0] sm:$0xff] }
  0x45   : > { %543 = vst [vmem:[%s782_s17 + $0x68] sm:$0xff] %v511_v9  ;;  %v422_v41 = vmax.f32 %v390_v31, 0.0  ;;  %v423_v43 = vmax.f32 %v391_v33, 0.0  ;;  %v392_v44 = vadd.f32 %v753_v42, %v357_v34  ;;  %v393_v45 = vadd.f32 %v753_v42, %v358_v35  ;;  %v463_v34 = vld [vmem:[%s747_s14 + $0xe8] sm:$0xff] }
  0x46   : > { %544 = vst [vmem:[%s782_s17 + $0x70] sm:$0xff] %v512_v18  ;;  %v482_v46 = vadd.f32 %v450_v23, %v418_v36  ;;  %v483_v47 = vadd.f32 %v451_v26, %v419_v37  ;;  %v484_v48 = vadd.f32 %v452_v29, %v420_v38  ;;  %v485_v50 = vadd.f32 %v453_v30, %v421_v39  ;;  %v461_v23 = vld [vmem:[%s747_s14 + $0xd8] sm:$0xff]  ;;  %v462_v26 = vld [vmem:[%s747_s14 + $0xe0] sm:$0xff] }
  0x47   : > { %545 = vst [vmem:[%s782_s17 + $0x78] sm:$0xff] %v513_v19  ;;  %v486_v53 = vadd.f32 %v454_v32, %v422_v41  ;;  %v487_v54 = vadd.f32 %v455_v40, %v423_v43  ;;  %v424_v55 = vmax.f32 %v392_v44, 0.0  ;;  %v425_v56 = vmax.f32 %v393_v45, 0.0  ;;  %v459_v19 = vld [vmem:[%s747_s14 + $0xc8] sm:$0xff]  ;;  %v464_v43 = vld [vmem:[%s747_s14 + $0xf0] sm:$0xff]  ;;  %v465_v44 = vld [vmem:[%s747_s14 + $0xf8] sm:$0xff] }
  0x48   : > { %v514_v60 = vmax.f32 %v482_v46, 0.0  ;;  %v515_v61 = vmax.f32 %v483_v47, 0.0  ;;  %v516_v62 = vmax.f32 %v484_v48, 0.0  ;;  %v517_v63 = vmax.f32 %v485_v50, 0.0 }
  0x49   : > { %v518_v2 = vmax.f32 %v486_v53, 0.0  ;;  %v519_v3 = vmax.f32 %v487_v54, 0.0  ;;  %v488_v4 = vadd.f32 %v456_v51, %v424_v55  ;;  %v489_v5 = vadd.f32 %v457_v49, %v425_v56 }
  0x4a   : > { %546 = vst [vmem:[%s782_s17 + $0x80] sm:$0xff] %v514_v60  ;;  %v359_v6 = vmul.f32 %v729_v24, %v324_v52  ;;  %v360_v7 = vmul.f32 %v729_v24, %v325_v57  ;;  %v361_v8 = vmul.f32 %v729_v24, %v326_v58  ;;  %v362_v9 = vmul.f32 %v729_v24, %v327_v59 }
  0x4b   : > { %547 = vst [vmem:[%s782_s17 + $0x88] sm:$0xff] %v515_v61  ;;  %v520_v12 = vmax.f32 %v488_v4, 0.0  ;;  %v521_v13 = vmax.f32 %v489_v5, 0.0  ;;  %v363_v14 = vmul.f32 %v729_v24, %v328_v0  ;;  %v364_v15 = vmul.f32 %v729_v24, %v329_v1 }
  0x4c   : > { %548 = vst [vmem:[%s782_s17 + $0x90] sm:$0xff] %v516_v62  ;;  %v394_v16 = vadd.f32 %v753_v42, %v359_v6  ;;  %v395_v18 = vadd.f32 %v753_v42, %v360_v7  ;;  %v396_v20 = vadd.f32 %v753_v42, %v361_v8  ;;  %v397_v21 = vadd.f32 %v753_v42, %v362_v9 }
  0x4d   : > { %549 = vst [vmem:[%s782_s17 + $0x98] sm:$0xff] %v517_v63  ;;  %v398_v25 = vadd.f32 %v753_v42, %v363_v14  ;;  %v399_v27 = vadd.f32 %v753_v42, %v364_v15  ;;  %v365_v28 = vmul.f32 %v729_v24, %v330_v10  ;;  %v366_v29 = vmul.f32 %v729_v24, %v331_v11 }
  0x4e   : > { %550 = vst [vmem:[%s782_s17 + $0xa0] sm:$0xff] %v518_v2  ;;  %v426_v30 = vmax.f32 %v394_v16, 0.0  ;;  %v427_v31 = vmax.f32 %v395_v18, 0.0  ;;  %v428_v32 = vmax.f32 %v396_v20, 0.0  ;;  %v429_v33 = vmax.f32 %v397_v21, 0.0 }
  0x4f   : > { %551 = vst [vmem:[%s782_s17 + $0xa8] sm:$0xff] %v519_v3  ;;  %v430_v35 = vmax.f32 %v398_v25, 0.0  ;;  %v431_v36 = vmax.f32 %v399_v27, 0.0  ;;  %v400_v37 = vadd.f32 %v753_v42, %v365_v28  ;;  %v401_v38 = vadd.f32 %v753_v42, %v366_v29 }
  0x50   : > { %552 = vst [vmem:[%s782_s17 + $0xb0] sm:$0xff] %v520_v12  ;;  %v490_v39 = vadd.f32 %v458_v17, %v426_v30  ;;  %v491_v40 = vadd.f32 %v459_v19, %v427_v31  ;;  %v492_v24 = vadd.f32 %v460_v22, %v428_v32  ;;  %v493_v41 = vadd.f32 %v461_v23, %v429_v33 }
  0x51   : > { %553 = vst [vmem:[%s782_s17 + $0xb8] sm:$0xff] %v521_v13  ;;  %v494_v45 = vadd.f32 %v462_v26, %v430_v35  ;;  %v495_v46 = vadd.f32 %v463_v34, %v431_v36  ;;  %v432_v47 = vmax.f32 %v400_v37, 0.0  ;;  %v433_v48 = vmax.f32 %v401_v38, 0.0 }
  0x52   : > { %v522_v50 = vmax.f32 %v490_v39, 0.0  ;;  %v523_v42 = vmax.f32 %v491_v40, 0.0  ;;  %v524_v51 = vmax.f32 %v492_v24, 0.0  ;;  %v525_v49 = vmax.f32 %v493_v41, 0.0 }
  0x53   : > { %v496_v52 = vadd.f32 %v464_v43, %v432_v47  ;;  %v497_v53 = vadd.f32 %v465_v44, %v433_v48  ;;  %v526_v54 = vmax.f32 %v494_v45, 0.0  ;;  %v527_v55 = vmax.f32 %v495_v46, 0.0 }
  0x54   : > { %554 = vst [vmem:[%s782_s17 + $0xc0] sm:$0xff] %v522_v50 }
  0x55   : > { %555 = vst [vmem:[%s782_s17 + $0xc8] sm:$0xff] %v523_v42  ;;  %v528_v56 = vmax.f32 %v496_v52, 0.0  ;;  %v529_v57 = vmax.f32 %v497_v53, 0.0 }
  0x56   : > { %556 = vst [vmem:[%s782_s17 + $0xd0] sm:$0xff] %v524_v51 }
  0x57   : > { %557 = vst [vmem:[%s782_s17 + $0xd8] sm:$0xff] %v525_v49 }
  0x58   : > { %558 = vst [vmem:[%s782_s17 + $0xe0] sm:$0xff] %v526_v54 }
  0x59   : > { %559 = vst [vmem:[%s782_s17 + $0xe8] sm:$0xff] %v527_v55 }
  0x5a   : > { %560 = vst [vmem:[%s782_s17 + $0xf0] sm:$0xff] %v528_v56 }
  0x5b   : > { %561 = vst [vmem:[%s782_s17 + $0xf8] sm:$0xff] %v529_v57 }
  0x5c PF: > { %s16_s21 = sadd.s32 1, %s659_s21  }
  0x5d   : > { %p13_p4 = scmp.ge.s32.totalorder %s16_s21, 4  }
  0x5f   :  { %15 = sbr.rel (!%p13_p4) target bundleno = 1 (0x1), region = 77 }

</bundles_post_ra>
